<compile_context>
chip_gen: v5e
topology: v5e:2x2
jax: 0.10.0
libtpu: 0.0.40
codegen_flags: <defaults>
</compile_context>

<pallas_src>
import jax
import jax.numpy as jnp
from jax.experimental import pallas as pl
from jax.experimental.pallas import tpu as pltpu

HIDDEN = 32
IN_FEATS = 3


def _lstm_rollout_kernel(feat_ref, h0_ref, c0_ref, wih_ref, whh_ref, b_ref,
                         wlin_ref, blin_ref, outs_ref, state_ref):
    B, H = h0_ref.shape
    T, _, F = feat_ref.shape
    G = 4 * H
    T_pad = outs_ref.shape[1]

    # Resident weight vregs (loaded once per kernel call, reused every step).
    whh = whh_ref[...]                                   # (H, 4H)
    bias = b_ref[...]                                    # (1, 4H)
    wlin = wlin_ref[...]                                 # (1, H)
    w_rows = [wih_ref[j:j + 1, :] for j in range(F)]     # F x (1, 4H)

    # Per-lane activation constants: sigmoid lanes (i, f, o) vs tanh lanes (g).
    lane = jax.lax.broadcasted_iota(jnp.int32, (1, G), 1)
    is_g = jnp.logical_and(lane >= 2 * H, lane < 3 * H)
    scale = jnp.where(is_g, 1.0, 0.5).astype(jnp.float32)   # also the output amplitude
    offset = jnp.where(is_g, 0.0, 0.5).astype(jnp.float32)

    t_lane = jax.lax.broadcasted_iota(jnp.int32, (1, T_pad), 1)

    def step(t, carry):
        h, c, acc = carry
        x = feat_ref[t]                                   # (B, F) for this step
        gates = jnp.dot(h, whh, preferred_element_type=jnp.float32) + bias
        for j in range(F):                                # 3 VPU FMAs replace the K=3 matmul
            gates = gates + x[:, j:j + 1] * w_rows[j]
        # One EUP tanh pass computes all four gate activations.
        act = scale * jnp.tanh(gates * scale) + offset
        i_g = act[:, 0 * H:1 * H]
        f_g = act[:, 1 * H:2 * H]
        g_g = act[:, 2 * H:3 * H]
        o_g = act[:, 3 * H:4 * H]
        c_new = f_g * c + i_g * g_g
        h_new = o_g * jnp.tanh(c_new)
        # Linear(H -> 1) without bias: lane reduction; scatter into lane t via one-hot.
        y = jnp.sum(h_new * wlin, axis=1, keepdims=True)              # (B, 1)
        acc = acc + y * (t_lane == t).astype(jnp.float32)             # (B, T_pad)
        return h_new, c_new, acc

    h0 = h0_ref[...]
    c0 = c0_ref[...]
    acc0 = jnp.zeros((B, T_pad), jnp.float32)
    h_f, c_f, acc = jax.lax.fori_loop(0, T, step, (h0, c0, acc0), unroll=T <= 16)

    # Linear bias + Softplus (beta=1, threshold=20, matching torch) in one vreg pass.
    y = acc + blin_ref[...]
    outs_ref[...] = jnp.where(y > 20.0, y,
                              jnp.log1p(jnp.exp(jnp.minimum(y, 20.0))))

    # Pack final (h, c) into one lane-dense state buffer: [h | c | zero pad].
    pieces = [h_f, c_f]
    pad = state_ref.shape[1] - 2 * H
    if pad:
        pieces.append(jnp.zeros((B, pad), jnp.float32))
    state_ref[...] = jnp.concatenate(pieces, axis=1)


def init_params(key, hidden_size=HIDDEN):
    """Deterministic init mimicking PyTorch LSTMCell/Linear uniform(-k, k)."""
    k_lstm = 1.0 / jnp.sqrt(hidden_size)
    k_lin = 1.0 / jnp.sqrt(hidden_size)
    ks = jax.random.split(key, 6)
    w_ih = jax.random.uniform(ks[0], (4 * hidden_size, IN_FEATS),
                              minval=-k_lstm, maxval=k_lstm, dtype=jnp.float32)
    w_hh = jax.random.uniform(ks[1], (4 * hidden_size, hidden_size),
                              minval=-k_lstm, maxval=k_lstm, dtype=jnp.float32)
    b_ih = jax.random.uniform(ks[2], (4 * hidden_size,),
                              minval=-k_lstm, maxval=k_lstm, dtype=jnp.float32)
    b_hh = jax.random.uniform(ks[3], (4 * hidden_size,),
                              minval=-k_lstm, maxval=k_lstm, dtype=jnp.float32)
    w_lin = jax.random.uniform(ks[4], (1, hidden_size),
                               minval=-k_lin, maxval=k_lin, dtype=jnp.float32)
    b_lin = jax.random.uniform(ks[5], (1,),
                               minval=-k_lin, maxval=k_lin, dtype=jnp.float32)
    return dict(w_ih=w_ih, w_hh=w_hh, b_ih=b_ih, b_hh=b_hh,
                w_lin=w_lin, b_lin=b_lin)


def prepare_params(params):
    """One-time layout prep, hoisted out of the per-rollout hot path."""
    H = params["w_hh"].shape[1]
    return dict(
        wih_rows=jnp.asarray(params["w_ih"].T, jnp.float32),                  # (3, 4H)
        whh_t=jnp.asarray(params["w_hh"].T, jnp.float32),                     # (H, 4H)
        bias=(params["b_ih"] + params["b_hh"]).reshape(1, 4 * H).astype(jnp.float32),
        wlin=jnp.asarray(params["w_lin"], jnp.float32),                       # (1, H)
        blin=params["b_lin"].reshape(1, 1).astype(jnp.float32),               # (1, 1)
    )


@jax.jit
def lstm_decision_rollout(prepared, features, h0, c0):
    """Fused multi-step rollout of the decision network.

    features: (B, T, 3) -- B independent chains, T sequential forward() calls
    h0, c0:   (B, H)
    returns:  outs (B, T) softplus outputs per step, plus final h_T, c_T (B, H).
    """
    B, T, F = features.shape
    H = h0.shape[1]
    T_pad = pl.cdiv(T, 128) * 128
    S_pad = max(128, pl.cdiv(2 * H, 128) * 128)
    feat_tbf = jnp.transpose(features, (1, 0, 2))    # (T, B, F): step-major for the loop

    bytes_acc = 4 * (feat_tbf.size + 2 * B * H + prepared["wih_rows"].size
                     + prepared["whh_t"].size + prepared["bias"].size
                     + prepared["wlin"].size + 1 + B * T_pad + B * S_pad)
    cost = pl.CostEstimate(
        flops=T * (2 * B * H * 4 * H + 24 * B * 4 * H + 2 * B * H),
        transcendentals=T * B * (4 * H + H) + B * T_pad,
        bytes_accessed=bytes_acc,
    )

    vmem = pl.BlockSpec(memory_space=pltpu.MemorySpace.VMEM)
    outs, state = pl.pallas_call(
        _lstm_rollout_kernel,
        out_shape=(jax.ShapeDtypeStruct((B, T_pad), jnp.float32),
                   jax.ShapeDtypeStruct((B, S_pad), jnp.float32)),
        in_specs=[vmem] * 8,
        out_specs=(vmem, vmem),
        cost_estimate=cost,
    )(feat_tbf, h0, c0, prepared["wih_rows"], prepared["whh_t"],
      prepared["bias"], prepared["wlin"], prepared["blin"])

    return outs[:, :T], state[:, :H], state[:, H:2 * H]


def lstm_decision_step(prepared, features, hx, cx):
    """Module-exact single forward(): features (1, 3) -> (out (1,), hx_new, cx_new)."""
    outs, h_new, c_new = lstm_decision_rollout(prepared, features[:, None, :], hx, cx)
    return outs[:, 0], h_new, c_new


def _reference_rollout(params, features, h0, c0):
    """Pure-JAX reference: T sequential (LSTMCell + Linear + Softplus) steps."""
    H = h0.shape[1]

    def step(carry, x_t):
        h, c = carry
        gates = (x_t @ params["w_ih"].T + params["b_ih"]
                 + h @ params["w_hh"].T + params["b_hh"])
        i = jax.nn.sigmoid(gates[:, 0 * H:1 * H])
        f = jax.nn.sigmoid(gates[:, 1 * H:2 * H])
        g = jnp.tanh(gates[:, 2 * H:3 * H])
        o = jax.nn.sigmoid(gates[:, 3 * H:4 * H])
        c_new = f * c + i * g
        h_new = o * jnp.tanh(c_new)
        y = jax.nn.softplus(h_new @ params["w_lin"].T + params["b_lin"])
        return (h_new, c_new), y[:, 0]

    (h_f, c_f), ys = jax.lax.scan(step, (h0, c0), jnp.transpose(features, (1, 0, 2)))
    return jnp.transpose(ys), h_f, c_f


if __name__ == "__main__":
    key = jax.random.PRNGKey(0)
    pkey, fkey, skey = jax.random.split(key, 3)
    params = init_params(pkey)
    prepared = prepare_params(params)    # hoisted one-time weight layout prep

    # --- fused rollout: B=8 independent decision-network chains, T=8 steps ---
    B, T = 8, 8
    features = jax.random.normal(fkey, (B, T, IN_FEATS), dtype=jnp.float32)
    h0 = jnp.zeros((B, HIDDEN), jnp.float32)    # reset(): zero hidden / cell state
    c0 = jnp.zeros((B, HIDDEN), jnp.float32)

    outs, h_f, c_f = lstm_decision_rollout(prepared, features, h0, c0)
    jax.block_until_ready((outs, h_f, c_f))

    r_outs, r_h, r_c = _reference_rollout(params, features, h0, c0)
    assert jnp.allclose(outs, r_outs, atol=1e-4, rtol=1e-4), (outs, r_outs)
    assert jnp.allclose(h_f, r_h, atol=1e-4, rtol=1e-4)
    assert jnp.allclose(c_f, r_c, atol=1e-4, rtol=1e-4)

    # --- module-exact single-step API: forward((1,3)) carrying (hx, cx) ---
    f_steps = jax.random.normal(skey, (1, 2, IN_FEATS), dtype=jnp.float32)
    hx = jnp.zeros((1, HIDDEN), jnp.float32)
    cx = jnp.zeros((1, HIDDEN), jnp.float32)
    o1, hx, cx = lstm_decision_step(prepared, f_steps[:, 0], hx, cx)
    o2, hx, cx = lstm_decision_step(prepared, f_steps[:, 1], hx, cx)
    jax.block_until_ready((o1, o2, hx, cx))

    r_o, r_hx, r_cx = _reference_rollout(params, f_steps,
                                         jnp.zeros((1, HIDDEN), jnp.float32),
                                         jnp.zeros((1, HIDDEN), jnp.float32))
    assert jnp.allclose(jnp.stack([o1[0], o2[0]]), r_o[0], atol=1e-4, rtol=1e-4)
    assert jnp.allclose(hx, r_hx, atol=1e-4, rtol=1e-4)
    assert jnp.allclose(cx, r_cx, atol=1e-4, rtol=1e-4)

    print("KERNEL_OK")
</pallas_src>

<mosaic_0001>
module attributes {stable_mosaic.version = 11 : i64} {
  func.func @_lstm_rollout_kernel(%arg0: memref<8x8x3xf32, #tpu.memory_space<vmem>>, %arg1: memref<8x32xf32, #tpu.memory_space<vmem>>, %arg2: memref<8x32xf32, #tpu.memory_space<vmem>>, %arg3: memref<3x128xf32, #tpu.memory_space<vmem>>, %arg4: memref<32x128xf32, #tpu.memory_space<vmem>>, %arg5: memref<1x128xf32, #tpu.memory_space<vmem>>, %arg6: memref<1x32xf32, #tpu.memory_space<vmem>>, %arg7: memref<1x1xf32, #tpu.memory_space<vmem>>, %arg8: memref<8x128xf32, #tpu.memory_space<vmem>>, %arg9: memref<8x128xf32, #tpu.memory_space<vmem>>) attributes {dimension_semantics = [], scalar_prefetch = 0 : i64, scratch_operands = 0 : i64, tpu.core_type = #tpu.core_type<tc>} {
    %c0 = arith.constant 0 : index
    %c0_0 = arith.constant 0 : index
    %0 = vector.load %arg4[%c0, %c0_0] : memref<32x128xf32, #tpu.memory_space<vmem>>, vector<32x128xf32>
    %c0_1 = arith.constant 0 : index
    %c0_2 = arith.constant 0 : index
    %1 = vector.load %arg5[%c0_1, %c0_2] : memref<1x128xf32, #tpu.memory_space<vmem>>, vector<1x128xf32>
    %c0_3 = arith.constant 0 : index
    %c0_4 = arith.constant 0 : index
    %2 = vector.load %arg6[%c0_3, %c0_4] : memref<1x32xf32, #tpu.memory_space<vmem>>, vector<1x32xf32>
    %c0_5 = arith.constant 0 : index
    %c0_6 = arith.constant 0 : index
    %3 = vector.load %arg3[%c0_5, %c0_6] : memref<3x128xf32, #tpu.memory_space<vmem>>, vector<1x128xf32>
    %c1 = arith.constant 1 : index
    %c0_7 = arith.constant 0 : index
    %4 = vector.load %arg3[%c1, %c0_7] : memref<3x128xf32, #tpu.memory_space<vmem>>, vector<1x128xf32>
    %c2 = arith.constant 2 : index
    %c0_8 = arith.constant 0 : index
    %5 = vector.load %arg3[%c2, %c0_8] : memref<3x128xf32, #tpu.memory_space<vmem>>, vector<1x128xf32>
    %6 = tpu.iota {dimensions = array<i32: 1>} : vector<1x128xi32>
    %c64_i32 = arith.constant 64 : i32
    %7 = vector.broadcast %c64_i32 : i32 to vector<1x128xi32>
    %8 = arith.cmpi sge, %6, %7 : vector<1x128xi32>
    %c96_i32 = arith.constant 96 : i32
    %9 = vector.broadcast %c96_i32 : i32 to vector<1x128xi32>
    %10 = arith.cmpi slt, %6, %9 : vector<1x128xi32>
    %11 = arith.andi %8, %10 : vector<1x128xi1>
    %cst = arith.constant 1.000000e+00 : f32
    %cst_9 = arith.constant 5.000000e-01 : f32
    %12 = vector.broadcast %cst : f32 to vector<1x128xf32>
    %13 = vector.broadcast %cst_9 : f32 to vector<1x128xf32>
    %14 = arith.select %11, %12, %13 : vector<1x128xi1>, vector<1x128xf32>
    %cst_10 = arith.constant 0.000000e+00 : f32
    %cst_11 = arith.constant 5.000000e-01 : f32
    %15 = vector.broadcast %cst_10 : f32 to vector<1x128xf32>
    %16 = vector.broadcast %cst_11 : f32 to vector<1x128xf32>
    %17 = arith.select %11, %15, %16 : vector<1x128xi1>, vector<1x128xf32>
    %18 = tpu.iota {dimensions = array<i32: 1>} : vector<1x128xi32>
    %c0_12 = arith.constant 0 : index
    %c0_13 = arith.constant 0 : index
    %19 = vector.load %arg1[%c0_12, %c0_13] : memref<8x32xf32, #tpu.memory_space<vmem>>, vector<8x32xf32>
    %c0_14 = arith.constant 0 : index
    %c0_15 = arith.constant 0 : index
    %20 = vector.load %arg2[%c0_14, %c0_15] : memref<8x32xf32, #tpu.memory_space<vmem>>, vector<8x32xf32>
    %cst_16 = arith.constant 0.000000e+00 : f32
    %21 = vector.broadcast %cst_16 : f32 to vector<8x128xf32>
    %c0_i32 = arith.constant 0 : i32
    %22 = arith.index_cast %c0_i32 : i32 to index
    %c0_17 = arith.constant 0 : index
    %c0_18 = arith.constant 0 : index
    %23 = vector.load %arg0[%22, %c0_17, %c0_18] : memref<8x8x3xf32, #tpu.memory_space<vmem>>, vector<1x8x3xf32>
    %24 = vector.shape_cast %23 : vector<1x8x3xf32> to vector<8x3xf32>
    %cst_19 = arith.constant dense<0.000000e+00> : vector<8x128xf32>
    %25 = tpu.matmul %19, %0, %cst_19 {dimension_numbers = #tpu.dot_dimension_numbers<[1], [0], [0], [1], [0, 0, 1, 1], [], []>} : vector<8x32xf32>, vector<32x128xf32>, vector<8x128xf32> -> vector<8x128xf32>
    %26 = vector.broadcast %1 : vector<1x128xf32> to vector<8x128xf32>
    %27 = arith.addf %25, %26 : vector<8x128xf32>
    %28 = vector.extract_strided_slice %24 {offsets = [0, 0], sizes = [8, 1], strides = [1, 1]} : vector<8x3xf32> to vector<8x1xf32>
    %29 = vector.broadcast %28 : vector<8x1xf32> to vector<8x128xf32>
    %30 = vector.broadcast %3 : vector<1x128xf32> to vector<8x128xf32>
    %31 = arith.mulf %29, %30 : vector<8x128xf32>
    %32 = arith.addf %27, %31 : vector<8x128xf32>
    %33 = vector.extract_strided_slice %24 {offsets = [0, 1], sizes = [8, 1], strides = [1, 1]} : vector<8x3xf32> to vector<8x1xf32>
    %34 = vector.broadcast %33 : vector<8x1xf32> to vector<8x128xf32>
    %35 = vector.broadcast %4 : vector<1x128xf32> to vector<8x128xf32>
    %36 = arith.mulf %34, %35 : vector<8x128xf32>
    %37 = arith.addf %32, %36 : vector<8x128xf32>
    %38 = vector.extract_strided_slice %24 {offsets = [0, 2], sizes = [8, 1], strides = [1, 1]} : vector<8x3xf32> to vector<8x1xf32>
    %39 = vector.broadcast %38 : vector<8x1xf32> to vector<8x128xf32>
    %40 = vector.broadcast %5 : vector<1x128xf32> to vector<8x128xf32>
    %41 = arith.mulf %39, %40 : vector<8x128xf32>
    %42 = arith.addf %37, %41 : vector<8x128xf32>
    %43 = vector.broadcast %14 : vector<1x128xf32> to vector<8x128xf32>
    %44 = arith.mulf %42, %43 : vector<8x128xf32>
    %45 = math.tanh %44 : vector<8x128xf32>
    %46 = vector.broadcast %14 : vector<1x128xf32> to vector<8x128xf32>
    %47 = arith.mulf %46, %45 : vector<8x128xf32>
    %48 = vector.broadcast %17 : vector<1x128xf32> to vector<8x128xf32>
    %49 = arith.addf %47, %48 : vector<8x128xf32>
    %50 = vector.extract_strided_slice %49 {offsets = [0, 0], sizes = [8, 32], strides = [1, 1]} : vector<8x128xf32> to vector<8x32xf32>
    %51 = vector.extract_strided_slice %49 {offsets = [0, 32], sizes = [8, 32], strides = [1, 1]} : vector<8x128xf32> to vector<8x32xf32>
    %52 = vector.extract_strided_slice %49 {offsets = [0, 64], sizes = [8, 32], strides = [1, 1]} : vector<8x128xf32> to vector<8x32xf32>
    %53 = vector.extract_strided_slice %49 {offsets = [0, 96], sizes = [8, 32], strides = [1, 1]} : vector<8x128xf32> to vector<8x32xf32>
    %54 = arith.mulf %51, %20 : vector<8x32xf32>
    %55 = arith.mulf %50, %52 : vector<8x32xf32>
    %56 = arith.addf %54, %55 : vector<8x32xf32>
    %57 = math.tanh %56 : vector<8x32xf32>
    %58 = arith.mulf %53, %57 : vector<8x32xf32>
    %59 = vector.broadcast %2 : vector<1x32xf32> to vector<8x32xf32>
    %60 = arith.mulf %58, %59 : vector<8x32xf32>
    %cst_20 = arith.constant dense<0.000000e+00> : vector<8xf32>
    %61 = vector.multi_reduction <add>, %60, %cst_20 [1] : vector<8x32xf32> to vector<8xf32>
    %62 = vector.shape_cast %61 : vector<8xf32> to vector<8x1xf32>
    %63 = vector.broadcast %c0_i32 : i32 to vector<1x128xi32>
    %64 = arith.cmpi eq, %18, %63 : vector<1x128xi32>
    %65 = arith.extui %64 : vector<1x128xi1> to vector<1x128xi32>
    %66 = arith.sitofp %65 : vector<1x128xi32> to vector<1x128xf32>
    %67 = vector.broadcast %62 : vector<8x1xf32> to vector<8x128xf32>
    %68 = vector.broadcast %66 : vector<1x128xf32> to vector<8x128xf32>
    %69 = arith.mulf %67, %68 : vector<8x128xf32>
    %70 = arith.addf %21, %69 : vector<8x128xf32>
    %c1_i32 = arith.constant 1 : i32
    %71 = arith.index_cast %c1_i32 : i32 to index
    %c0_21 = arith.constant 0 : index
    %c0_22 = arith.constant 0 : index
    %72 = vector.load %arg0[%71, %c0_21, %c0_22] : memref<8x8x3xf32, #tpu.memory_space<vmem>>, vector<1x8x3xf32>
    %73 = vector.shape_cast %72 : vector<1x8x3xf32> to vector<8x3xf32>
    %cst_23 = arith.constant dense<0.000000e+00> : vector<8x128xf32>
    %74 = tpu.matmul %58, %0, %cst_23 {dimension_numbers = #tpu.dot_dimension_numbers<[1], [0], [0], [1], [0, 0, 1, 1], [], []>} : vector<8x32xf32>, vector<32x128xf32>, vector<8x128xf32> -> vector<8x128xf32>
    %75 = vector.broadcast %1 : vector<1x128xf32> to vector<8x128xf32>
    %76 = arith.addf %74, %75 : vector<8x128xf32>
    %77 = vector.extract_strided_slice %73 {offsets = [0, 0], sizes = [8, 1], strides = [1, 1]} : vector<8x3xf32> to vector<8x1xf32>
    %78 = vector.broadcast %77 : vector<8x1xf32> to vector<8x128xf32>
    %79 = vector.broadcast %3 : vector<1x128xf32> to vector<8x128xf32>
    %80 = arith.mulf %78, %79 : vector<8x128xf32>
    %81 = arith.addf %76, %80 : vector<8x128xf32>
    %82 = vector.extract_strided_slice %73 {offsets = [0, 1], sizes = [8, 1], strides = [1, 1]} : vector<8x3xf32> to vector<8x1xf32>
    %83 = vector.broadcast %82 : vector<8x1xf32> to vector<8x128xf32>
    %84 = vector.broadcast %4 : vector<1x128xf32> to vector<8x128xf32>
    %85 = arith.mulf %83, %84 : vector<8x128xf32>
    %86 = arith.addf %81, %85 : vector<8x128xf32>
    %87 = vector.extract_strided_slice %73 {offsets = [0, 2], sizes = [8, 1], strides = [1, 1]} : vector<8x3xf32> to vector<8x1xf32>
    %88 = vector.broadcast %87 : vector<8x1xf32> to vector<8x128xf32>
    %89 = vector.broadcast %5 : vector<1x128xf32> to vector<8x128xf32>
    %90 = arith.mulf %88, %89 : vector<8x128xf32>
    %91 = arith.addf %86, %90 : vector<8x128xf32>
    %92 = vector.broadcast %14 : vector<1x128xf32> to vector<8x128xf32>
    %93 = arith.mulf %91, %92 : vector<8x128xf32>
    %94 = math.tanh %93 : vector<8x128xf32>
    %95 = vector.broadcast %14 : vector<1x128xf32> to vector<8x128xf32>
    %96 = arith.mulf %95, %94 : vector<8x128xf32>
    %97 = vector.broadcast %17 : vector<1x128xf32> to vector<8x128xf32>
    %98 = arith.addf %96, %97 : vector<8x128xf32>
    %99 = vector.extract_strided_slice %98 {offsets = [0, 0], sizes = [8, 32], strides = [1, 1]} : vector<8x128xf32> to vector<8x32xf32>
    %100 = vector.extract_strided_slice %98 {offsets = [0, 32], sizes = [8, 32], strides = [1, 1]} : vector<8x128xf32> to vector<8x32xf32>
    %101 = vector.extract_strided_slice %98 {offsets = [0, 64], sizes = [8, 32], strides = [1, 1]} : vector<8x128xf32> to vector<8x32xf32>
    %102 = vector.extract_strided_slice %98 {offsets = [0, 96], sizes = [8, 32], strides = [1, 1]} : vector<8x128xf32> to vector<8x32xf32>
    %103 = arith.mulf %100, %56 : vector<8x32xf32>
    %104 = arith.mulf %99, %101 : vector<8x32xf32>
    %105 = arith.addf %103, %104 : vector<8x32xf32>
    %106 = math.tanh %105 : vector<8x32xf32>
    %107 = arith.mulf %102, %106 : vector<8x32xf32>
    %108 = vector.broadcast %2 : vector<1x32xf32> to vector<8x32xf32>
    %109 = arith.mulf %107, %108 : vector<8x32xf32>
    %cst_24 = arith.constant dense<0.000000e+00> : vector<8xf32>
    %110 = vector.multi_reduction <add>, %109, %cst_24 [1] : vector<8x32xf32> to vector<8xf32>
    %111 = vector.shape_cast %110 : vector<8xf32> to vector<8x1xf32>
    %112 = vector.broadcast %c1_i32 : i32 to vector<1x128xi32>
    %113 = arith.cmpi eq, %18, %112 : vector<1x128xi32>
    %114 = arith.extui %113 : vector<1x128xi1> to vector<1x128xi32>
    %115 = arith.sitofp %114 : vector<1x128xi32> to vector<1x128xf32>
    %116 = vector.broadcast %111 : vector<8x1xf32> to vector<8x128xf32>
    %117 = vector.broadcast %115 : vector<1x128xf32> to vector<8x128xf32>
    %118 = arith.mulf %116, %117 : vector<8x128xf32>
    %119 = arith.addf %70, %118 : vector<8x128xf32>
    %c2_i32 = arith.constant 2 : i32
    %120 = arith.index_cast %c2_i32 : i32 to index
    %c0_25 = arith.constant 0 : index
    %c0_26 = arith.constant 0 : index
    %121 = vector.load %arg0[%120, %c0_25, %c0_26] : memref<8x8x3xf32, #tpu.memory_space<vmem>>, vector<1x8x3xf32>
    %122 = vector.shape_cast %121 : vector<1x8x3xf32> to vector<8x3xf32>
    %cst_27 = arith.constant dense<0.000000e+00> : vector<8x128xf32>
    %123 = tpu.matmul %107, %0, %cst_27 {dimension_numbers = #tpu.dot_dimension_numbers<[1], [0], [0], [1], [0, 0, 1, 1], [], []>} : vector<8x32xf32>, vector<32x128xf32>, vector<8x128xf32> -> vector<8x128xf32>
    %124 = vector.broadcast %1 : vector<1x128xf32> to vector<8x128xf32>
    %125 = arith.addf %123, %124 : vector<8x128xf32>
    %126 = vector.extract_strided_slice %122 {offsets = [0, 0], sizes = [8, 1], strides = [1, 1]} : vector<8x3xf32> to vector<8x1xf32>
    %127 = vector.broadcast %126 : vector<8x1xf32> to vector<8x128xf32>
    %128 = vector.broadcast %3 : vector<1x128xf32> to vector<8x128xf32>
    %129 = arith.mulf %127, %128 : vector<8x128xf32>
    %130 = arith.addf %125, %129 : vector<8x128xf32>
    %131 = vector.extract_strided_slice %122 {offsets = [0, 1], sizes = [8, 1], strides = [1, 1]} : vector<8x3xf32> to vector<8x1xf32>
    %132 = vector.broadcast %131 : vector<8x1xf32> to vector<8x128xf32>
    %133 = vector.broadcast %4 : vector<1x128xf32> to vector<8x128xf32>
    %134 = arith.mulf %132, %133 : vector<8x128xf32>
    %135 = arith.addf %130, %134 : vector<8x128xf32>
    %136 = vector.extract_strided_slice %122 {offsets = [0, 2], sizes = [8, 1], strides = [1, 1]} : vector<8x3xf32> to vector<8x1xf32>
    %137 = vector.broadcast %136 : vector<8x1xf32> to vector<8x128xf32>
    %138 = vector.broadcast %5 : vector<1x128xf32> to vector<8x128xf32>
    %139 = arith.mulf %137, %138 : vector<8x128xf32>
    %140 = arith.addf %135, %139 : vector<8x128xf32>
    %141 = vector.broadcast %14 : vector<1x128xf32> to vector<8x128xf32>
    %142 = arith.mulf %140, %141 : vector<8x128xf32>
    %143 = math.tanh %142 : vector<8x128xf32>
    %144 = vector.broadcast %14 : vector<1x128xf32> to vector<8x128xf32>
    %145 = arith.mulf %144, %143 : vector<8x128xf32>
    %146 = vector.broadcast %17 : vector<1x128xf32> to vector<8x128xf32>
    %147 = arith.addf %145, %146 : vector<8x128xf32>
    %148 = vector.extract_strided_slice %147 {offsets = [0, 0], sizes = [8, 32], strides = [1, 1]} : vector<8x128xf32> to vector<8x32xf32>
    %149 = vector.extract_strided_slice %147 {offsets = [0, 32], sizes = [8, 32], strides = [1, 1]} : vector<8x128xf32> to vector<8x32xf32>
    %150 = vector.extract_strided_slice %147 {offsets = [0, 64], sizes = [8, 32], strides = [1, 1]} : vector<8x128xf32> to vector<8x32xf32>
    %151 = vector.extract_strided_slice %147 {offsets = [0, 96], sizes = [8, 32], strides = [1, 1]} : vector<8x128xf32> to vector<8x32xf32>
    %152 = arith.mulf %149, %105 : vector<8x32xf32>
    %153 = arith.mulf %148, %150 : vector<8x32xf32>
    %154 = arith.addf %152, %153 : vector<8x32xf32>
    %155 = math.tanh %154 : vector<8x32xf32>
    %156 = arith.mulf %151, %155 : vector<8x32xf32>
    %157 = vector.broadcast %2 : vector<1x32xf32> to vector<8x32xf32>
    %158 = arith.mulf %156, %157 : vector<8x32xf32>
    %cst_28 = arith.constant dense<0.000000e+00> : vector<8xf32>
    %159 = vector.multi_reduction <add>, %158, %cst_28 [1] : vector<8x32xf32> to vector<8xf32>
    %160 = vector.shape_cast %159 : vector<8xf32> to vector<8x1xf32>
    %161 = vector.broadcast %c2_i32 : i32 to vector<1x128xi32>
    %162 = arith.cmpi eq, %18, %161 : vector<1x128xi32>
    %163 = arith.extui %162 : vector<1x128xi1> to vector<1x128xi32>
    %164 = arith.sitofp %163 : vector<1x128xi32> to vector<1x128xf32>
    %165 = vector.broadcast %160 : vector<8x1xf32> to vector<8x128xf32>
    %166 = vector.broadcast %164 : vector<1x128xf32> to vector<8x128xf32>
    %167 = arith.mulf %165, %166 : vector<8x128xf32>
    %168 = arith.addf %119, %167 : vector<8x128xf32>
    %c3_i32 = arith.constant 3 : i32
    %169 = arith.index_cast %c3_i32 : i32 to index
    %c0_29 = arith.constant 0 : index
    %c0_30 = arith.constant 0 : index
    %170 = vector.load %arg0[%169, %c0_29, %c0_30] : memref<8x8x3xf32, #tpu.memory_space<vmem>>, vector<1x8x3xf32>
    %171 = vector.shape_cast %170 : vector<1x8x3xf32> to vector<8x3xf32>
    %cst_31 = arith.constant dense<0.000000e+00> : vector<8x128xf32>
    %172 = tpu.matmul %156, %0, %cst_31 {dimension_numbers = #tpu.dot_dimension_numbers<[1], [0], [0], [1], [0, 0, 1, 1], [], []>} : vector<8x32xf32>, vector<32x128xf32>, vector<8x128xf32> -> vector<8x128xf32>
    %173 = vector.broadcast %1 : vector<1x128xf32> to vector<8x128xf32>
    %174 = arith.addf %172, %173 : vector<8x128xf32>
    %175 = vector.extract_strided_slice %171 {offsets = [0, 0], sizes = [8, 1], strides = [1, 1]} : vector<8x3xf32> to vector<8x1xf32>
    %176 = vector.broadcast %175 : vector<8x1xf32> to vector<8x128xf32>
    %177 = vector.broadcast %3 : vector<1x128xf32> to vector<8x128xf32>
    %178 = arith.mulf %176, %177 : vector<8x128xf32>
    %179 = arith.addf %174, %178 : vector<8x128xf32>
    %180 = vector.extract_strided_slice %171 {offsets = [0, 1], sizes = [8, 1], strides = [1, 1]} : vector<8x3xf32> to vector<8x1xf32>
    %181 = vector.broadcast %180 : vector<8x1xf32> to vector<8x128xf32>
    %182 = vector.broadcast %4 : vector<1x128xf32> to vector<8x128xf32>
    %183 = arith.mulf %181, %182 : vector<8x128xf32>
    %184 = arith.addf %179, %183 : vector<8x128xf32>
    %185 = vector.extract_strided_slice %171 {offsets = [0, 2], sizes = [8, 1], strides = [1, 1]} : vector<8x3xf32> to vector<8x1xf32>
    %186 = vector.broadcast %185 : vector<8x1xf32> to vector<8x128xf32>
    %187 = vector.broadcast %5 : vector<1x128xf32> to vector<8x128xf32>
    %188 = arith.mulf %186, %187 : vector<8x128xf32>
    %189 = arith.addf %184, %188 : vector<8x128xf32>
    %190 = vector.broadcast %14 : vector<1x128xf32> to vector<8x128xf32>
    %191 = arith.mulf %189, %190 : vector<8x128xf32>
    %192 = math.tanh %191 : vector<8x128xf32>
    %193 = vector.broadcast %14 : vector<1x128xf32> to vector<8x128xf32>
    %194 = arith.mulf %193, %192 : vector<8x128xf32>
    %195 = vector.broadcast %17 : vector<1x128xf32> to vector<8x128xf32>
    %196 = arith.addf %194, %195 : vector<8x128xf32>
    %197 = vector.extract_strided_slice %196 {offsets = [0, 0], sizes = [8, 32], strides = [1, 1]} : vector<8x128xf32> to vector<8x32xf32>
    %198 = vector.extract_strided_slice %196 {offsets = [0, 32], sizes = [8, 32], strides = [1, 1]} : vector<8x128xf32> to vector<8x32xf32>
    %199 = vector.extract_strided_slice %196 {offsets = [0, 64], sizes = [8, 32], strides = [1, 1]} : vector<8x128xf32> to vector<8x32xf32>
    %200 = vector.extract_strided_slice %196 {offsets = [0, 96], sizes = [8, 32], strides = [1, 1]} : vector<8x128xf32> to vector<8x32xf32>
    %201 = arith.mulf %198, %154 : vector<8x32xf32>
    %202 = arith.mulf %197, %199 : vector<8x32xf32>
    %203 = arith.addf %201, %202 : vector<8x32xf32>
    %204 = math.tanh %203 : vector<8x32xf32>
    %205 = arith.mulf %200, %204 : vector<8x32xf32>
    %206 = vector.broadcast %2 : vector<1x32xf32> to vector<8x32xf32>
    %207 = arith.mulf %205, %206 : vector<8x32xf32>
    %cst_32 = arith.constant dense<0.000000e+00> : vector<8xf32>
    %208 = vector.multi_reduction <add>, %207, %cst_32 [1] : vector<8x32xf32> to vector<8xf32>
    %209 = vector.shape_cast %208 : vector<8xf32> to vector<8x1xf32>
    %210 = vector.broadcast %c3_i32 : i32 to vector<1x128xi32>
    %211 = arith.cmpi eq, %18, %210 : vector<1x128xi32>
    %212 = arith.extui %211 : vector<1x128xi1> to vector<1x128xi32>
    %213 = arith.sitofp %212 : vector<1x128xi32> to vector<1x128xf32>
    %214 = vector.broadcast %209 : vector<8x1xf32> to vector<8x128xf32>
    %215 = vector.broadcast %213 : vector<1x128xf32> to vector<8x128xf32>
    %216 = arith.mulf %214, %215 : vector<8x128xf32>
    %217 = arith.addf %168, %216 : vector<8x128xf32>
    %c4_i32 = arith.constant 4 : i32
    %218 = arith.index_cast %c4_i32 : i32 to index
    %c0_33 = arith.constant 0 : index
    %c0_34 = arith.constant 0 : index
    %219 = vector.load %arg0[%218, %c0_33, %c0_34] : memref<8x8x3xf32, #tpu.memory_space<vmem>>, vector<1x8x3xf32>
    %220 = vector.shape_cast %219 : vector<1x8x3xf32> to vector<8x3xf32>
    %cst_35 = arith.constant dense<0.000000e+00> : vector<8x128xf32>
    %221 = tpu.matmul %205, %0, %cst_35 {dimension_numbers = #tpu.dot_dimension_numbers<[1], [0], [0], [1], [0, 0, 1, 1], [], []>} : vector<8x32xf32>, vector<32x128xf32>, vector<8x128xf32> -> vector<8x128xf32>
    %222 = vector.broadcast %1 : vector<1x128xf32> to vector<8x128xf32>
    %223 = arith.addf %221, %222 : vector<8x128xf32>
    %224 = vector.extract_strided_slice %220 {offsets = [0, 0], sizes = [8, 1], strides = [1, 1]} : vector<8x3xf32> to vector<8x1xf32>
    %225 = vector.broadcast %224 : vector<8x1xf32> to vector<8x128xf32>
    %226 = vector.broadcast %3 : vector<1x128xf32> to vector<8x128xf32>
    %227 = arith.mulf %225, %226 : vector<8x128xf32>
    %228 = arith.addf %223, %227 : vector<8x128xf32>
    %229 = vector.extract_strided_slice %220 {offsets = [0, 1], sizes = [8, 1], strides = [1, 1]} : vector<8x3xf32> to vector<8x1xf32>
    %230 = vector.broadcast %229 : vector<8x1xf32> to vector<8x128xf32>
    %231 = vector.broadcast %4 : vector<1x128xf32> to vector<8x128xf32>
    %232 = arith.mulf %230, %231 : vector<8x128xf32>
    %233 = arith.addf %228, %232 : vector<8x128xf32>
    %234 = vector.extract_strided_slice %220 {offsets = [0, 2], sizes = [8, 1], strides = [1, 1]} : vector<8x3xf32> to vector<8x1xf32>
    %235 = vector.broadcast %234 : vector<8x1xf32> to vector<8x128xf32>
    %236 = vector.broadcast %5 : vector<1x128xf32> to vector<8x128xf32>
    %237 = arith.mulf %235, %236 : vector<8x128xf32>
    %238 = arith.addf %233, %237 : vector<8x128xf32>
    %239 = vector.broadcast %14 : vector<1x128xf32> to vector<8x128xf32>
    %240 = arith.mulf %238, %239 : vector<8x128xf32>
    %241 = math.tanh %240 : vector<8x128xf32>
    %242 = vector.broadcast %14 : vector<1x128xf32> to vector<8x128xf32>
    %243 = arith.mulf %242, %241 : vector<8x128xf32>
    %244 = vector.broadcast %17 : vector<1x128xf32> to vector<8x128xf32>
    %245 = arith.addf %243, %244 : vector<8x128xf32>
    %246 = vector.extract_strided_slice %245 {offsets = [0, 0], sizes = [8, 32], strides = [1, 1]} : vector<8x128xf32> to vector<8x32xf32>
    %247 = vector.extract_strided_slice %245 {offsets = [0, 32], sizes = [8, 32], strides = [1, 1]} : vector<8x128xf32> to vector<8x32xf32>
    %248 = vector.extract_strided_slice %245 {offsets = [0, 64], sizes = [8, 32], strides = [1, 1]} : vector<8x128xf32> to vector<8x32xf32>
    %249 = vector.extract_strided_slice %245 {offsets = [0, 96], sizes = [8, 32], strides = [1, 1]} : vector<8x128xf32> to vector<8x32xf32>
    %250 = arith.mulf %247, %203 : vector<8x32xf32>
    %251 = arith.mulf %246, %248 : vector<8x32xf32>
    %252 = arith.addf %250, %251 : vector<8x32xf32>
    %253 = math.tanh %252 : vector<8x32xf32>
    %254 = arith.mulf %249, %253 : vector<8x32xf32>
    %255 = vector.broadcast %2 : vector<1x32xf32> to vector<8x32xf32>
    %256 = arith.mulf %254, %255 : vector<8x32xf32>
    %cst_36 = arith.constant dense<0.000000e+00> : vector<8xf32>
    %257 = vector.multi_reduction <add>, %256, %cst_36 [1] : vector<8x32xf32> to vector<8xf32>
    %258 = vector.shape_cast %257 : vector<8xf32> to vector<8x1xf32>
    %259 = vector.broadcast %c4_i32 : i32 to vector<1x128xi32>
    %260 = arith.cmpi eq, %18, %259 : vector<1x128xi32>
    %261 = arith.extui %260 : vector<1x128xi1> to vector<1x128xi32>
    %262 = arith.sitofp %261 : vector<1x128xi32> to vector<1x128xf32>
    %263 = vector.broadcast %258 : vector<8x1xf32> to vector<8x128xf32>
    %264 = vector.broadcast %262 : vector<1x128xf32> to vector<8x128xf32>
    %265 = arith.mulf %263, %264 : vector<8x128xf32>
    %266 = arith.addf %217, %265 : vector<8x128xf32>
    %c5_i32 = arith.constant 5 : i32
    %267 = arith.index_cast %c5_i32 : i32 to index
    %c0_37 = arith.constant 0 : index
    %c0_38 = arith.constant 0 : index
    %268 = vector.load %arg0[%267, %c0_37, %c0_38] : memref<8x8x3xf32, #tpu.memory_space<vmem>>, vector<1x8x3xf32>
    %269 = vector.shape_cast %268 : vector<1x8x3xf32> to vector<8x3xf32>
    %cst_39 = arith.constant dense<0.000000e+00> : vector<8x128xf32>
    %270 = tpu.matmul %254, %0, %cst_39 {dimension_numbers = #tpu.dot_dimension_numbers<[1], [0], [0], [1], [0, 0, 1, 1], [], []>} : vector<8x32xf32>, vector<32x128xf32>, vector<8x128xf32> -> vector<8x128xf32>
    %271 = vector.broadcast %1 : vector<1x128xf32> to vector<8x128xf32>
    %272 = arith.addf %270, %271 : vector<8x128xf32>
    %273 = vector.extract_strided_slice %269 {offsets = [0, 0], sizes = [8, 1], strides = [1, 1]} : vector<8x3xf32> to vector<8x1xf32>
    %274 = vector.broadcast %273 : vector<8x1xf32> to vector<8x128xf32>
    %275 = vector.broadcast %3 : vector<1x128xf32> to vector<8x128xf32>
    %276 = arith.mulf %274, %275 : vector<8x128xf32>
    %277 = arith.addf %272, %276 : vector<8x128xf32>
    %278 = vector.extract_strided_slice %269 {offsets = [0, 1], sizes = [8, 1], strides = [1, 1]} : vector<8x3xf32> to vector<8x1xf32>
    %279 = vector.broadcast %278 : vector<8x1xf32> to vector<8x128xf32>
    %280 = vector.broadcast %4 : vector<1x128xf32> to vector<8x128xf32>
    %281 = arith.mulf %279, %280 : vector<8x128xf32>
    %282 = arith.addf %277, %281 : vector<8x128xf32>
    %283 = vector.extract_strided_slice %269 {offsets = [0, 2], sizes = [8, 1], strides = [1, 1]} : vector<8x3xf32> to vector<8x1xf32>
    %284 = vector.broadcast %283 : vector<8x1xf32> to vector<8x128xf32>
    %285 = vector.broadcast %5 : vector<1x128xf32> to vector<8x128xf32>
    %286 = arith.mulf %284, %285 : vector<8x128xf32>
    %287 = arith.addf %282, %286 : vector<8x128xf32>
    %288 = vector.broadcast %14 : vector<1x128xf32> to vector<8x128xf32>
    %289 = arith.mulf %287, %288 : vector<8x128xf32>
    %290 = math.tanh %289 : vector<8x128xf32>
    %291 = vector.broadcast %14 : vector<1x128xf32> to vector<8x128xf32>
    %292 = arith.mulf %291, %290 : vector<8x128xf32>
    %293 = vector.broadcast %17 : vector<1x128xf32> to vector<8x128xf32>
    %294 = arith.addf %292, %293 : vector<8x128xf32>
    %295 = vector.extract_strided_slice %294 {offsets = [0, 0], sizes = [8, 32], strides = [1, 1]} : vector<8x128xf32> to vector<8x32xf32>
    %296 = vector.extract_strided_slice %294 {offsets = [0, 32], sizes = [8, 32], strides = [1, 1]} : vector<8x128xf32> to vector<8x32xf32>
    %297 = vector.extract_strided_slice %294 {offsets = [0, 64], sizes = [8, 32], strides = [1, 1]} : vector<8x128xf32> to vector<8x32xf32>
    %298 = vector.extract_strided_slice %294 {offsets = [0, 96], sizes = [8, 32], strides = [1, 1]} : vector<8x128xf32> to vector<8x32xf32>
    %299 = arith.mulf %296, %252 : vector<8x32xf32>
    %300 = arith.mulf %295, %297 : vector<8x32xf32>
    %301 = arith.addf %299, %300 : vector<8x32xf32>
    %302 = math.tanh %301 : vector<8x32xf32>
    %303 = arith.mulf %298, %302 : vector<8x32xf32>
    %304 = vector.broadcast %2 : vector<1x32xf32> to vector<8x32xf32>
    %305 = arith.mulf %303, %304 : vector<8x32xf32>
    %cst_40 = arith.constant dense<0.000000e+00> : vector<8xf32>
    %306 = vector.multi_reduction <add>, %305, %cst_40 [1] : vector<8x32xf32> to vector<8xf32>
    %307 = vector.shape_cast %306 : vector<8xf32> to vector<8x1xf32>
    %308 = vector.broadcast %c5_i32 : i32 to vector<1x128xi32>
    %309 = arith.cmpi eq, %18, %308 : vector<1x128xi32>
    %310 = arith.extui %309 : vector<1x128xi1> to vector<1x128xi32>
    %311 = arith.sitofp %310 : vector<1x128xi32> to vector<1x128xf32>
    %312 = vector.broadcast %307 : vector<8x1xf32> to vector<8x128xf32>
    %313 = vector.broadcast %311 : vector<1x128xf32> to vector<8x128xf32>
    %314 = arith.mulf %312, %313 : vector<8x128xf32>
    %315 = arith.addf %266, %314 : vector<8x128xf32>
    %c6_i32 = arith.constant 6 : i32
    %316 = arith.index_cast %c6_i32 : i32 to index
    %c0_41 = arith.constant 0 : index
    %c0_42 = arith.constant 0 : index
    %317 = vector.load %arg0[%316, %c0_41, %c0_42] : memref<8x8x3xf32, #tpu.memory_space<vmem>>, vector<1x8x3xf32>
    %318 = vector.shape_cast %317 : vector<1x8x3xf32> to vector<8x3xf32>
    %cst_43 = arith.constant dense<0.000000e+00> : vector<8x128xf32>
    %319 = tpu.matmul %303, %0, %cst_43 {dimension_numbers = #tpu.dot_dimension_numbers<[1], [0], [0], [1], [0, 0, 1, 1], [], []>} : vector<8x32xf32>, vector<32x128xf32>, vector<8x128xf32> -> vector<8x128xf32>
    %320 = vector.broadcast %1 : vector<1x128xf32> to vector<8x128xf32>
    %321 = arith.addf %319, %320 : vector<8x128xf32>
    %322 = vector.extract_strided_slice %318 {offsets = [0, 0], sizes = [8, 1], strides = [1, 1]} : vector<8x3xf32> to vector<8x1xf32>
    %323 = vector.broadcast %322 : vector<8x1xf32> to vector<8x128xf32>
    %324 = vector.broadcast %3 : vector<1x128xf32> to vector<8x128xf32>
    %325 = arith.mulf %323, %324 : vector<8x128xf32>
    %326 = arith.addf %321, %325 : vector<8x128xf32>
    %327 = vector.extract_strided_slice %318 {offsets = [0, 1], sizes = [8, 1], strides = [1, 1]} : vector<8x3xf32> to vector<8x1xf32>
    %328 = vector.broadcast %327 : vector<8x1xf32> to vector<8x128xf32>
    %329 = vector.broadcast %4 : vector<1x128xf32> to vector<8x128xf32>
    %330 = arith.mulf %328, %329 : vector<8x128xf32>
    %331 = arith.addf %326, %330 : vector<8x128xf32>
    %332 = vector.extract_strided_slice %318 {offsets = [0, 2], sizes = [8, 1], strides = [1, 1]} : vector<8x3xf32> to vector<8x1xf32>
    %333 = vector.broadcast %332 : vector<8x1xf32> to vector<8x128xf32>
    %334 = vector.broadcast %5 : vector<1x128xf32> to vector<8x128xf32>
    %335 = arith.mulf %333, %334 : vector<8x128xf32>
    %336 = arith.addf %331, %335 : vector<8x128xf32>
    %337 = vector.broadcast %14 : vector<1x128xf32> to vector<8x128xf32>
    %338 = arith.mulf %336, %337 : vector<8x128xf32>
    %339 = math.tanh %338 : vector<8x128xf32>
    %340 = vector.broadcast %14 : vector<1x128xf32> to vector<8x128xf32>
    %341 = arith.mulf %340, %339 : vector<8x128xf32>
    %342 = vector.broadcast %17 : vector<1x128xf32> to vector<8x128xf32>
    %343 = arith.addf %341, %342 : vector<8x128xf32>
    %344 = vector.extract_strided_slice %343 {offsets = [0, 0], sizes = [8, 32], strides = [1, 1]} : vector<8x128xf32> to vector<8x32xf32>
    %345 = vector.extract_strided_slice %343 {offsets = [0, 32], sizes = [8, 32], strides = [1, 1]} : vector<8x128xf32> to vector<8x32xf32>
    %346 = vector.extract_strided_slice %343 {offsets = [0, 64], sizes = [8, 32], strides = [1, 1]} : vector<8x128xf32> to vector<8x32xf32>
    %347 = vector.extract_strided_slice %343 {offsets = [0, 96], sizes = [8, 32], strides = [1, 1]} : vector<8x128xf32> to vector<8x32xf32>
    %348 = arith.mulf %345, %301 : vector<8x32xf32>
    %349 = arith.mulf %344, %346 : vector<8x32xf32>
    %350 = arith.addf %348, %349 : vector<8x32xf32>
    %351 = math.tanh %350 : vector<8x32xf32>
    %352 = arith.mulf %347, %351 : vector<8x32xf32>
    %353 = vector.broadcast %2 : vector<1x32xf32> to vector<8x32xf32>
    %354 = arith.mulf %352, %353 : vector<8x32xf32>
    %cst_44 = arith.constant dense<0.000000e+00> : vector<8xf32>
    %355 = vector.multi_reduction <add>, %354, %cst_44 [1] : vector<8x32xf32> to vector<8xf32>
    %356 = vector.shape_cast %355 : vector<8xf32> to vector<8x1xf32>
    %357 = vector.broadcast %c6_i32 : i32 to vector<1x128xi32>
    %358 = arith.cmpi eq, %18, %357 : vector<1x128xi32>
    %359 = arith.extui %358 : vector<1x128xi1> to vector<1x128xi32>
    %360 = arith.sitofp %359 : vector<1x128xi32> to vector<1x128xf32>
    %361 = vector.broadcast %356 : vector<8x1xf32> to vector<8x128xf32>
    %362 = vector.broadcast %360 : vector<1x128xf32> to vector<8x128xf32>
    %363 = arith.mulf %361, %362 : vector<8x128xf32>
    %364 = arith.addf %315, %363 : vector<8x128xf32>
    %c7_i32 = arith.constant 7 : i32
    %365 = arith.index_cast %c7_i32 : i32 to index
    %c0_45 = arith.constant 0 : index
    %c0_46 = arith.constant 0 : index
    %366 = vector.load %arg0[%365, %c0_45, %c0_46] : memref<8x8x3xf32, #tpu.memory_space<vmem>>, vector<1x8x3xf32>
    %367 = vector.shape_cast %366 : vector<1x8x3xf32> to vector<8x3xf32>
    %cst_47 = arith.constant dense<0.000000e+00> : vector<8x128xf32>
    %368 = tpu.matmul %352, %0, %cst_47 {dimension_numbers = #tpu.dot_dimension_numbers<[1], [0], [0], [1], [0, 0, 1, 1], [], []>} : vector<8x32xf32>, vector<32x128xf32>, vector<8x128xf32> -> vector<8x128xf32>
    %369 = vector.broadcast %1 : vector<1x128xf32> to vector<8x128xf32>
    %370 = arith.addf %368, %369 : vector<8x128xf32>
    %371 = vector.extract_strided_slice %367 {offsets = [0, 0], sizes = [8, 1], strides = [1, 1]} : vector<8x3xf32> to vector<8x1xf32>
    %372 = vector.broadcast %371 : vector<8x1xf32> to vector<8x128xf32>
    %373 = vector.broadcast %3 : vector<1x128xf32> to vector<8x128xf32>
    %374 = arith.mulf %372, %373 : vector<8x128xf32>
    %375 = arith.addf %370, %374 : vector<8x128xf32>
    %376 = vector.extract_strided_slice %367 {offsets = [0, 1], sizes = [8, 1], strides = [1, 1]} : vector<8x3xf32> to vector<8x1xf32>
    %377 = vector.broadcast %376 : vector<8x1xf32> to vector<8x128xf32>
    %378 = vector.broadcast %4 : vector<1x128xf32> to vector<8x128xf32>
    %379 = arith.mulf %377, %378 : vector<8x128xf32>
    %380 = arith.addf %375, %379 : vector<8x128xf32>
    %381 = vector.extract_strided_slice %367 {offsets = [0, 2], sizes = [8, 1], strides = [1, 1]} : vector<8x3xf32> to vector<8x1xf32>
    %382 = vector.broadcast %381 : vector<8x1xf32> to vector<8x128xf32>
    %383 = vector.broadcast %5 : vector<1x128xf32> to vector<8x128xf32>
    %384 = arith.mulf %382, %383 : vector<8x128xf32>
    %385 = arith.addf %380, %384 : vector<8x128xf32>
    %386 = vector.broadcast %14 : vector<1x128xf32> to vector<8x128xf32>
    %387 = arith.mulf %385, %386 : vector<8x128xf32>
    %388 = math.tanh %387 : vector<8x128xf32>
    %389 = vector.broadcast %14 : vector<1x128xf32> to vector<8x128xf32>
    %390 = arith.mulf %389, %388 : vector<8x128xf32>
    %391 = vector.broadcast %17 : vector<1x128xf32> to vector<8x128xf32>
    %392 = arith.addf %390, %391 : vector<8x128xf32>
    %393 = vector.extract_strided_slice %392 {offsets = [0, 0], sizes = [8, 32], strides = [1, 1]} : vector<8x128xf32> to vector<8x32xf32>
    %394 = vector.extract_strided_slice %392 {offsets = [0, 32], sizes = [8, 32], strides = [1, 1]} : vector<8x128xf32> to vector<8x32xf32>
    %395 = vector.extract_strided_slice %392 {offsets = [0, 64], sizes = [8, 32], strides = [1, 1]} : vector<8x128xf32> to vector<8x32xf32>
    %396 = vector.extract_strided_slice %392 {offsets = [0, 96], sizes = [8, 32], strides = [1, 1]} : vector<8x128xf32> to vector<8x32xf32>
    %397 = arith.mulf %394, %350 : vector<8x32xf32>
    %398 = arith.mulf %393, %395 : vector<8x32xf32>
    %399 = arith.addf %397, %398 : vector<8x32xf32>
    %400 = math.tanh %399 : vector<8x32xf32>
    %401 = arith.mulf %396, %400 : vector<8x32xf32>
    %402 = vector.broadcast %2 : vector<1x32xf32> to vector<8x32xf32>
    %403 = arith.mulf %401, %402 : vector<8x32xf32>
    %cst_48 = arith.constant dense<0.000000e+00> : vector<8xf32>
    %404 = vector.multi_reduction <add>, %403, %cst_48 [1] : vector<8x32xf32> to vector<8xf32>
    %405 = vector.shape_cast %404 : vector<8xf32> to vector<8x1xf32>
    %406 = vector.broadcast %c7_i32 : i32 to vector<1x128xi32>
    %407 = arith.cmpi eq, %18, %406 : vector<1x128xi32>
    %408 = arith.extui %407 : vector<1x128xi1> to vector<1x128xi32>
    %409 = arith.sitofp %408 : vector<1x128xi32> to vector<1x128xf32>
    %410 = vector.broadcast %405 : vector<8x1xf32> to vector<8x128xf32>
    %411 = vector.broadcast %409 : vector<1x128xf32> to vector<8x128xf32>
    %412 = arith.mulf %410, %411 : vector<8x128xf32>
    %413 = arith.addf %364, %412 : vector<8x128xf32>
    %c8_i32 = arith.constant 8 : i32
    %c0_49 = arith.constant 0 : index
    %c0_50 = arith.constant 0 : index
    %414 = vector.load %arg7[%c0_49, %c0_50] : memref<1x1xf32, #tpu.memory_space<vmem>>, vector<1x1xf32>
    %415 = vector.broadcast %414 : vector<1x1xf32> to vector<8x128xf32>
    %416 = arith.addf %413, %415 : vector<8x128xf32>
    %cst_51 = arith.constant 2.000000e+01 : f32
    %417 = vector.broadcast %cst_51 : f32 to vector<8x128xf32>
    %418 = arith.cmpf ogt, %416, %417 : vector<8x128xf32>
    %cst_52 = arith.constant 2.000000e+01 : f32
    %419 = vector.broadcast %cst_52 : f32 to vector<8x128xf32>
    %420 = arith.minimumf %416, %419 : vector<8x128xf32>
    %421 = math.exp %420 : vector<8x128xf32>
    %422 = math.log1p %421 : vector<8x128xf32>
    %423 = arith.select %418, %416, %422 : vector<8x128xi1>, vector<8x128xf32>
    %c0_53 = arith.constant 0 : index
    %c0_54 = arith.constant 0 : index
    %424 = vector.load %arg8[%c0_53, %c0_54] : memref<8x128xf32, #tpu.memory_space<vmem>>, vector<8x128xf32>
    tpu.vector_store %arg8[%c0_53, %c0_54], %423 {strides = array<i32>} : memref<8x128xf32, #tpu.memory_space<vmem>>, vector<8x128xf32>,
    %cst_55 = arith.constant 0.000000e+00 : f32
    %425 = vector.broadcast %cst_55 : f32 to vector<8x64xf32>
    %426 = tpu.concatenate %401, %399, %425 in 1 : vector<8x32xf32>, vector<8x32xf32>, vector<8x64xf32> -> vector<8x128xf32>
    %c0_56 = arith.constant 0 : index
    %c0_57 = arith.constant 0 : index
    %427 = vector.load %arg9[%c0_56, %c0_57] : memref<8x128xf32, #tpu.memory_space<vmem>>, vector<8x128xf32>
    tpu.vector_store %arg9[%c0_56, %c0_57], %426 {strides = array<i32>} : memref<8x128xf32, #tpu.memory_space<vmem>>, vector<8x128xf32>,
    return
  }
}

</mosaic_0001>

<bundles_post_ra>
// kernel: lstm_decision_rollout.1
= control target key start
LH: loop header
LB: loop body
LE: loop exit
PB: predicated region body
PF: predicated region fallthrough
CT: control target
= control target key end

     0   :  { %s1207_s0 = inlined_call_operand.vmem [shape: f32[8,8,3], index: 0, kind: input, shape index: {}]   ;;  %s1208_s1 = inlined_call_operand.vmem [shape: f32[8,32], index: 1, kind: input, shape index: {}]   ;;  %s1209_s2 = inlined_call_operand.vmem [shape: f32[8,32], index: 2, kind: input, shape index: {}]   ;;  %s1210_s3 = inlined_call_operand.vmem [shape: f32[3,128], index: 3, kind: input, shape index: {}]   ;;  %s1211_s4 = inlined_call_operand.vmem [shape: f32[32,128], index: 4, kind: input, shape index: {}]   ;;  %s1212_s5 = inlined_call_operand.vmem [shape: f32[1,128], index: 5, kind: input, shape index: {}]   ;;  %s1213_s6 = inlined_call_operand.vmem [shape: f32[1,32], index: 6, kind: input, shape index: {}]   ;;  %s1214_s7 = inlined_call_operand.<no memory space> [shape: f32[1,1], index: 7, kind: input, shape index: {}]   ;;  %s1215_s8 = inlined_call_operand.hbm [shape: f32[8,128], index: 8, kind: output, shape index: {0}]   ;;  %s1216_s9 = inlined_call_operand.vmem [shape: f32[8,128], index: 9, kind: output, shape index: {1}]  }
   0x1   :  { %v15_v0 = vstv %s1214_s7 }
   0x2   :  { %16 = vst [vmem:[#allocation2] sm:$0x1] %v15_v0 }
   0x3   :  { %v37_v1 = vld [vmem:[%s1211_s4 + $0x18] sm:$0xff]  ;;  %v36_v2 = vld [vmem:[%s1211_s4 + $0x10] sm:$0xff]  ;;  %v35_v3 = vld [vmem:[%s1211_s4 + $0x8] sm:$0xff]  ;;  %v881_v4 = vmov 0   ;;  %v882_v6 = vmov 2   ;;  %s883_s22 = smov 32  }
   0x4   :  { %72 = vmatpush.msra.mxu0 %v37_v1  ;;  %788 = vset.pattern.permute.xlu0 %v881_v4  ;;  %v52_v5 = vld [vmem:[%s1207_s0] sm:$0xff] }
   0x5   :  { %82 = vperm.xlu0 %788, %v52_v5   ;;  %790 = vset.pattern.permute.xlu1 %v882_v6  ;;  %v51_v7 = vld [vmem:[%s1209_s2] sm:$0xff] }
   0x6   :  { %73 = vmatpush.msra.mxu0 %v36_v2  ;;  %96 = vperm.xlu1 %790, %v52_v5   ;;  %v34_v8 = vld [vmem:[%s1211_s4] sm:$0xff] }
   0x7   :  { %107 = vrot.lane.b32.xlu2 %v51_v7, %s883_s22  ;;  %164 = vmatpush.msra.mxu1 %v37_v1 }
   0x8   :  { %17 = vsyncpa [#allocation4], 0  ;;  %74 = vmatpush.msra.mxu0 %v35_v3  ;;  %v50_v9 = vld [vmem:[%s1208_s1] sm:$0xff]  ;;  %vm56_vm0 = vcmask 261120   ;;  %793 = vset.pattern.permute.xlu2 %v882_v6  ;;  %v884_v10 = vmov 1   ;;  %v43_v12 = vlaneseq  ;;  %v885_v27 = vmov 0.5  }
   0x9   :  { %165 = vmatpush.msra.mxu1 %v36_v2  ;;  %244 = vmatpush.msra.mxu2 %v37_v1  ;;  %v977_v14 = vld [vmem:[%s1210_s3] ss:$0 sm:$0xff]  ;;  %v987_v16 = vld [vmem:[%s1210_s3 + $0x1] ss:$0 sm:$0xff]  ;;  %v992_v18 = vld [vmem:[%s1210_s3 + $0x2] ss:$0 sm:$0xff] }
   0xa   :  { %75 = vmatpush.msra.mxu0 %v34_v8  ;;  %324 = vmatpush.msra.mxu3 %v37_v1  ;;  %v972_v13 = vand.u32 127, %v43_v12  ;;  %v982_v15 = vld [vmem:[%s1212_s5] ss:$0 sm:$0xff]  ;;  %s886_s3 = smov 64   ;;  %v758_v44 = vld [vmem:[%s1207_s0 + $0x8] sm:$0xff]  ;;  %v761_v7 = vld [vmem:[%s1207_s0 + $0x10] sm:$0xff] }
   0xb   :  { %756 = vmatmul.msk.f32.vlgmr.msra.gmra.mxu0 %vm56_vm0, %v50_v9  ;;  %166 = vmatpush.msra.mxu1 %v35_v3  ;;  %s887_s24 = smov 96   ;;  %vm733_vm12 = vcmask 523264   ;;  %s743_s25 = sshll.u32 %s1215_s8, 4  ;;  %s744_s25 = int_to_ptr.hbm [resolvable:$true] %s743_s25 }
   0xc   :  { %245 = vmatpush.msra.mxu2 %v36_v2  ;;  %325 = vmatpush.msra.mxu3 %v36_v2  ;;  %vm45_vm1 = vcmp.ge.s32.totalorder %v972_v13, 64  ;;  %vm46_vm2 = vcmp.lt.s32.totalorder %v972_v13, 96  ;;  %vm220_vm4 = vcmp.eq.s32.totalorder %v972_v13, 1  ;;  %vm140_vm5 = vcmp.eq.s32.totalorder %v972_v13, 0 }
   0xd   :  { %789 = vset.pattern.permute.xlu0 %v884_v10  ;;  %167 = vmatpush.msra.mxu1 %v34_v8  ;;  %vm47_vm3 = vmand %vm45_vm1, %vm46_vm2  ;;  %vm300_vm6 = vcmp.eq.s32.totalorder %v972_v13, 2  ;;  %vm380_vm7 = vcmp.eq.s32.totalorder %v972_v13, 3  ;;  %vm460_vm8 = vcmp.eq.s32.totalorder %v972_v13, 4  ;;  %vm540_vm9 = vcmp.eq.s32.totalorder %v972_v13, 5 }
   0xe   :  { %89 = vperm.xlu0 %789, %v52_v5   ;;  %792 = vset.pattern.permute.xlu1 %v884_v10  ;;  %v1000_v28 = vsel %vm47_vm3, 1.0, %v885_v27  ;;  %v1003_v32 = vsel %vm47_vm3, 0.0, %v885_v27  ;;  %vm620_vm10 = vcmp.eq.s32.totalorder %v972_v13, 6  ;;  %vm700_vm11 = vcmp.eq.s32.totalorder %v972_v13, 7 }
   0xf   :  { %246 = vmatpush.msra.mxu2 %v35_v3  ;;  %326 = vmatpush.msra.mxu3 %v35_v3 }
  0x10   :  { %404 = vmatpush.msrb.mxu0 %v37_v1  ;;  %484 = vmatpush.msrb.mxu1 %v37_v1 }
  0x11   :  { %247 = vmatpush.msra.mxu2 %v34_v8  ;;  %327 = vmatpush.msra.mxu3 %v34_v8 }
  0x12   :  { %405 = vmatpush.msrb.mxu0 %v36_v2  ;;  %485 = vmatpush.msrb.mxu1 %v36_v2 }
  0x13   :  { %564 = vmatpush.msrb.mxu2 %v37_v1  ;;  %644 = vmatpush.msrb.mxu3 %v37_v1 }
  0x14   :  { %406 = vmatpush.msrb.mxu0 %v35_v3  ;;  %486 = vmatpush.msrb.mxu1 %v35_v3 }
  0x15   :  { %565 = vmatpush.msrb.mxu2 %v36_v2  ;;  %645 = vmatpush.msrb.mxu3 %v36_v2 }
  0x16   :  { %791 = vset.pattern.permute.xlu0 %v881_v4  ;;  %407 = vmatpush.msrb.mxu0 %v34_v8 }
  0x17   :  { %487 = vmatpush.msrb.mxu1 %v34_v8  ;;  %566 = vmatpush.msrb.mxu2 %v35_v3 }
  0x18   :  { %646 = vmatpush.msrb.mxu3 %v35_v3  ;;  %174 = vperm.xlu0 %791, %v758_v44  }
  0x19   :  { %567 = vmatpush.msrb.mxu2 %v34_v8 }
  0x1a   :  { %647 = vmatpush.msrb.mxu3 %v34_v8 }
  0x20   :  { %795 = vset.pattern.permute.xlu0 %v884_v10 }
  0x61   :  { %v108_v37 = vpop.permute.xlu2 %107 }
  0x77   :  { %v83_v11 = vpop.permute.xlu0 %82 }
  0x78   :  { %v97_v20 = vpop.permute.xlu1 %96  ;;  %v86_v21 = vmul.f32 %v977_v14, %v83_v11 }
  0x79   :  { %v100_v25 = vmul.f32 %v992_v18, %v97_v20 }
  0x80   :  { %v90_v17 = vpop.permute.xlu0 %89 }
  0x81   :  { %v93_v23 = vmul.f32 %v987_v16, %v90_v17 }
  0x88   :  { %v77_v19 = vpop.f32.mrf.mxu0 }
  0x89   :  { %v78_v22 = vadd.f32 %v982_v15, %v77_v19 }
  0x8a   :  { %v175_v46 = vpop.permute.xlu0 %174 }
  0x8b   :  { %v87_v24 = vadd.f32 %v86_v21, %v78_v22  ;;  %v177_v48 = vmul.f32 %v977_v14, %v175_v46 }
  0x8d   :  { %v94_v26 = vadd.f32 %v93_v23, %v87_v24 }
  0x8f   :  { %v101_v29 = vadd.f32 %v100_v25, %v94_v26 }
  0x91   :  { %v102_v30 = vmul.f32 %v101_v29, %v1000_v28 }
  0x93   :  { %819 = vtanh.f32 %v102_v30 }
  0x99   :  { %v820_v31 = vpop.eup %819 }
  0x9a   :  { %v104_v33 = vmul.f32 %v820_v31, %v1000_v28 }
  0x9c   :  { %v105_v34 = vadd.f32 %v104_v33, %v1003_v32 }
  0x9e   :  { %112 = vrot.lane.b32.xlu1 %v105_v34, %s886_s3  ;;  %v110_v38 = vmul.f32 %v108_v37, %v105_v34 }
 0x110   :  { %v113_v35 = vpop.permute.xlu1 %112 }
 0x111   :  { %v115_v36 = vmul.f32 %v113_v35, %v105_v34 }
 0x113   :  { %117 = vrot.lane.b32.xlu2 %v115_v36, %s883_s22 }
 0x16d   :  { %v118_v39 = vpop.permute.xlu2 %117 }
 0x16e   :  { %v120_v40 = vadd.f32 %v118_v39, %v110_v38 }
 0x170   :  { %821 = vtanh.f32 %v120_v40 }
 0x176   :  { %v822_v41 = vpop.eup %821 }
 0x177   :  { %123 = vrot.lane.b32.xlu1 %v822_v41, %s886_s3 }
 0x17f   :  { %180 = vperm.xlu1 %792, %v758_v44  }
 0x187   :  { %796 = vset.pattern.permute.xlu1 %v882_v6 }
 0x1e9   :  { %v124_v42 = vpop.permute.xlu1 %123 }
 0x1ea   :  { %v1010_v43 = vmul.f32 %v124_v42, %v105_v34 }
 0x1ec   :  { %148 = vrot.lane.b32.xlu2 %v1010_v43, %s883_s22 }
 0x1f1   :  { %v181_v47 = vpop.permute.xlu1 %180 }
 0x1f2   :  { %v183_v52 = vmul.f32 %v987_v16, %v181_v47 }
 0x1f4   :  { %186 = vperm.xlu2 %793, %v758_v44  }
 0x1fc   :  { %794 = vset.pattern.permute.xlu2 %v881_v4 }
 0x246   :  { %v149_v45 = vpop.permute.xlu2 %148 }
 0x247   :  { %759 = vmatmul.msk.f32.vlgmr.msra.gmra.mxu1 %vm56_vm0, %v149_v45 }
 0x24e   :  { %v187_v50 = vpop.permute.xlu2 %186 }
 0x24f   :  { %v189_v54 = vmul.f32 %v992_v18, %v187_v50 }
 0x2c4   :  { %v169_v49 = vpop.f32.mrf.mxu1 }
 0x2c5   :  { %v170_v51 = vadd.f32 %v982_v15, %v169_v49 }
 0x2c7   :  { %v178_v53 = vadd.f32 %v177_v48, %v170_v51 }
 0x2c9   :  { %v184_v55 = vadd.f32 %v183_v52, %v178_v53 }
 0x2cb   :  { %v190_v56 = vadd.f32 %v189_v54, %v184_v55 }
 0x2cd   :  { %v191_v57 = vmul.f32 %v190_v56, %v1000_v28 }
 0x2cf   :  { %823 = vtanh.f32 %v191_v57 }
 0x2d5   :  { %v824_v58 = vpop.eup %823 }
 0x2d6   :  { %v193_v59 = vmul.f32 %v824_v58, %v1000_v28 }
 0x2d8   :  { %v194_v60 = vadd.f32 %v193_v59, %v1003_v32 }
 0x2da   :  { %197 = vrot.lane.b32.xlu1 %v194_v60, %s886_s3  ;;  %v195_v63 = vmul.f32 %v194_v60, %v120_v40  ;;  %v764_v40 = vld [vmem:[%s1207_s0 + $0x18] sm:$0xff] }
 0x34c   :  { %v198_v61 = vpop.permute.xlu1 %197 }
 0x34d   :  { %v200_v62 = vmul.f32 %v198_v61, %v194_v60 }
 0x34f   :  { %202 = vrot.lane.b32.xlu2 %v200_v62, %s883_s22 }
 0x357   :  { %254 = vperm.xlu2 %794, %v761_v7  }
 0x35f   :  { %798 = vset.pattern.permute.xlu2 %v884_v10 }
 0x3a9   :  { %v203_v0 = vpop.permute.xlu2 %202 }
 0x3aa   :  { %v205_v1 = vadd.f32 %v203_v0, %v195_v63 }
 0x3ac   :  { %825 = vtanh.f32 %v205_v1 }
 0x3b1   :  { %v255_v9 = vpop.permute.xlu2 %254 }
 0x3b2   :  { %v826_v2 = vpop.eup %825  ;;  %v257_v12 = vmul.f32 %v977_v14, %v255_v9 }
 0x3b3   :  { %208 = vrot.lane.b32.xlu0 %v826_v2, %s886_s3  ;;  %v767_v2 = vld [vmem:[%s1207_s0 + $0x20] sm:$0xff] }
 0x3bb   :  { %260 = vperm.xlu0 %795, %v761_v7  }
 0x3c3   :  { %799 = vset.pattern.permute.xlu0 %v882_v6 }
 0x425   :  { %v209_v3 = vpop.permute.xlu0 %208 }
 0x426   :  { %v1031_v5 = vmul.f32 %v209_v3, %v194_v60 }
 0x428   :  { %228 = vrot.lane.b32.xlu1 %v1031_v5, %s883_s22 }
 0x42d   :  { %v261_v11 = vpop.permute.xlu0 %260 }
 0x42e   :  { %v263_v21 = vmul.f32 %v987_v16, %v261_v11 }
 0x430   :  { %266 = vperm.xlu1 %796, %v761_v7  }
 0x438   :  { %797 = vset.pattern.permute.xlu1 %v881_v4 }
 0x49a   :  { %v229_v8 = vpop.permute.xlu1 %228 }
 0x49b   :  { %762 = vmatmul.msk.f32.vlgmr.msra.gmra.mxu2 %vm56_vm0, %v229_v8 }
 0x4a2   :  { %v267_v19 = vpop.permute.xlu1 %266 }
 0x4a3   :  { %v269_v23 = vmul.f32 %v992_v18, %v267_v19 }
 0x51e   :  { %v249_v17 = vpop.f32.mrf.mxu2 }
 0x51f   :  { %v250_v20 = vadd.f32 %v982_v15, %v249_v17 }
 0x521   :  { %v258_v22 = vadd.f32 %v257_v12, %v250_v20 }
 0x523   :  { %v264_v24 = vadd.f32 %v263_v21, %v258_v22 }
 0x525   :  { %v270_v25 = vadd.f32 %v269_v23, %v264_v24 }
 0x527   :  { %v271_v26 = vmul.f32 %v270_v25, %v1000_v28 }
 0x529   :  { %827 = vtanh.f32 %v271_v26 }
 0x52f   :  { %v828_v27 = vpop.eup %827 }
 0x530   :  { %v273_v29 = vmul.f32 %v828_v27, %v1000_v28 }
 0x532   :  { %v274_v30 = vadd.f32 %v273_v29, %v1003_v32 }
 0x534   :  { %277 = vrot.lane.b32.xlu2 %v274_v30, %s886_s3  ;;  %v275_v34 = vmul.f32 %v274_v30, %v205_v1 }
 0x58e   :  { %v278_v31 = vpop.permute.xlu2 %277 }
 0x58f   :  { %v280_v33 = vmul.f32 %v278_v31, %v274_v30 }
 0x591   :  { %282 = vrot.lane.b32.xlu1 %v280_v33, %s883_s22 }
 0x599   :  { %334 = vperm.xlu1 %797, %v764_v40  }
 0x5a1   :  { %801 = vset.pattern.permute.xlu1 %v884_v10 }
 0x603   :  { %v283_v35 = vpop.permute.xlu1 %282 }
 0x604   :  { %v285_v36 = vadd.f32 %v283_v35, %v275_v34 }
 0x606   :  { %829 = vtanh.f32 %v285_v36 }
 0x60b   :  { %v335_v42 = vpop.permute.xlu1 %334 }
 0x60c   :  { %v830_v37 = vpop.eup %829  ;;  %v337_v45 = vmul.f32 %v977_v14, %v335_v42 }
 0x60d   :  { %288 = vrot.lane.b32.xlu2 %v830_v37, %s886_s3 }
 0x615   :  { %340 = vperm.xlu2 %798, %v764_v40  }
 0x61d   :  { %802 = vset.pattern.permute.xlu2 %v882_v6 }
 0x667   :  { %v289_v38 = vpop.permute.xlu2 %288 }
 0x668   :  { %v1052_v39 = vmul.f32 %v289_v38, %v274_v30  ;;  %v770_v38 = vld [vmem:[%s1207_s0 + $0x28] sm:$0xff] }
 0x66a   :  { %308 = vrot.lane.b32.xlu0 %v1052_v39, %s883_s22 }
 0x66f   :  { %v341_v44 = vpop.permute.xlu2 %340 }
 0x670   :  { %v343_v49 = vmul.f32 %v987_v16, %v341_v44 }
 0x672   :  { %346 = vperm.xlu0 %799, %v764_v40  }
 0x67a   :  { %800 = vset.pattern.permute.xlu0 %v881_v4 }
 0x67b   :  { %414 = vperm.xlu0 %800, %v767_v2  }
 0x683   :  { %804 = vset.pattern.permute.xlu0 %v884_v10 }
 0x6dc   :  { %v309_v41 = vpop.permute.xlu0 %308 }
 0x6dd   :  { %765 = vmatmul.msk.f32.vlgmr.msra.gmra.mxu3 %vm56_vm0, %v309_v41 }
 0x6e4   :  { %v347_v47 = vpop.permute.xlu0 %346 }
 0x6e5   :  { %v349_v51 = vmul.f32 %v992_v18, %v347_v47 }
 0x6ed   :  { %v415_v7 = vpop.permute.xlu0 %414 }
 0x6ee   :  { %v417_v9 = vmul.f32 %v977_v14, %v415_v7 }
 0x760   :  { %v329_v46 = vpop.f32.mrf.mxu3 }
 0x761   :  { %v330_v48 = vadd.f32 %v982_v15, %v329_v46 }
 0x763   :  { %v338_v50 = vadd.f32 %v337_v45, %v330_v48 }
 0x765   :  { %v344_v52 = vadd.f32 %v343_v49, %v338_v50 }
 0x767   :  { %v350_v53 = vadd.f32 %v349_v51, %v344_v52 }
 0x769   :  { %v351_v54 = vmul.f32 %v350_v53, %v1000_v28 }
 0x76b   :  { %831 = vtanh.f32 %v351_v54 }
 0x771   :  { %v832_v55 = vpop.eup %831 }
 0x772   :  { %v353_v56 = vmul.f32 %v832_v55, %v1000_v28 }
 0x774   :  { %v354_v57 = vadd.f32 %v353_v56, %v1003_v32 }
 0x776   :  { %357 = vrot.lane.b32.xlu1 %v354_v57, %s886_s3  ;;  %v355_v60 = vmul.f32 %v354_v57, %v285_v36 }
 0x7e8   :  { %v358_v58 = vpop.permute.xlu1 %357 }
 0x7e9   :  { %v360_v59 = vmul.f32 %v358_v58, %v354_v57 }
 0x7eb   :  { %362 = vrot.lane.b32.xlu2 %v360_v59, %s883_s22 }
 0x845   :  { %v363_v61 = vpop.permute.xlu2 %362 }
 0x846   :  { %v365_v62 = vadd.f32 %v363_v61, %v355_v60 }
 0x848   :  { %833 = vtanh.f32 %v365_v62 }
 0x84e   :  { %v834_v63 = vpop.eup %833 }
 0x84f   :  { %368 = vrot.lane.b32.xlu1 %v834_v63, %s886_s3  ;;  %v773_v63 = vld [vmem:[%s1207_s0 + $0x30] sm:$0xff] }
 0x857   :  { %420 = vperm.xlu1 %801, %v767_v2  }
 0x85f   :  { %805 = vset.pattern.permute.xlu1 %v882_v6 }
 0x8c1   :  { %v369_v0 = vpop.permute.xlu1 %368 }
 0x8c2   :  { %v1073_v1 = vmul.f32 %v369_v0, %v354_v57 }
 0x8c4   :  { %388 = vrot.lane.b32.xlu2 %v1073_v1, %s883_s22 }
 0x8c9   :  { %v421_v8 = vpop.permute.xlu1 %420 }
 0x8ca   :  { %v423_v19 = vmul.f32 %v987_v16, %v421_v8 }
 0x8cc   :  { %426 = vperm.xlu2 %802, %v767_v2  }
 0x8d4   :  { %803 = vset.pattern.permute.xlu2 %v881_v4 }
 0x91e   :  { %v389_v3 = vpop.permute.xlu2 %388 }
 0x91f   :  { %768 = vmatmul.msk.f32.vlgmr.msrb.gmra.mxu0 %vm56_vm0, %v389_v3  ;;  %v776_v3 = vld [vmem:[%s1207_s0 + $0x38] sm:$0xff] }
 0x926   :  { %v427_v12 = vpop.permute.xlu2 %426 }
 0x927   :  { %v429_v21 = vmul.f32 %v992_v18, %v427_v12 }
 0x99c   :  { %v409_v11 = vpop.f32.mrf.mxu0 }
 0x99d   :  { %v410_v17 = vadd.f32 %v982_v15, %v409_v11 }
 0x99f   :  { %v418_v20 = vadd.f32 %v417_v9, %v410_v17 }
 0x9a1   :  { %v424_v22 = vadd.f32 %v423_v19, %v418_v20 }
 0x9a3   :  { %v430_v23 = vadd.f32 %v429_v21, %v424_v22 }
 0x9a5   :  { %v431_v24 = vmul.f32 %v430_v23, %v1000_v28 }
 0x9a7   :  { %835 = vtanh.f32 %v431_v24 }
 0x9ad   :  { %v836_v25 = vpop.eup %835 }
 0x9ae   :  { %v433_v26 = vmul.f32 %v836_v25, %v1000_v28 }
 0x9b0   :  { %v434_v27 = vadd.f32 %v433_v26, %v1003_v32 }
 0x9b2   :  { %437 = vrot.lane.b32.xlu1 %v434_v27, %s886_s3  ;;  %v435_v31 = vmul.f32 %v434_v27, %v365_v62 }
 0xa24   :  { %v438_v29 = vpop.permute.xlu1 %437 }
 0xa25   :  { %v440_v30 = vmul.f32 %v438_v29, %v434_v27 }
 0xa27   :  { %442 = vrot.lane.b32.xlu2 %v440_v30, %s883_s22 }
 0xa2f   :  { %494 = vperm.xlu2 %803, %v770_v38  }
 0xa37   :  { %807 = vset.pattern.permute.xlu2 %v884_v10 }
 0xa81   :  { %v443_v33 = vpop.permute.xlu2 %442 }
 0xa82   :  { %v445_v34 = vadd.f32 %v443_v33, %v435_v31 }
 0xa84   :  { %837 = vtanh.f32 %v445_v34 }
 0xa89   :  { %v495_v41 = vpop.permute.xlu2 %494 }
 0xa8a   :  { %v838_v35 = vpop.eup %837  ;;  %v497_v44 = vmul.f32 %v977_v14, %v495_v41 }
 0xa8b   :  { %448 = vrot.lane.b32.xlu0 %v838_v35, %s886_s3 }
 0xa93   :  { %500 = vperm.xlu0 %804, %v770_v38  }
 0xa9b   :  { %808 = vset.pattern.permute.xlu0 %v882_v6 }
 0xafd   :  { %v449_v36 = vpop.permute.xlu0 %448 }
 0xafe   :  { %v1094_v37 = vmul.f32 %v449_v36, %v434_v27 }
 0xb00   :  { %468 = vrot.lane.b32.xlu1 %v1094_v37, %s883_s22 }
 0xb05   :  { %v501_v42 = vpop.permute.xlu0 %500 }
 0xb06   :  { %v503_v48 = vmul.f32 %v987_v16, %v501_v42 }
 0xb08   :  { %506 = vperm.xlu1 %805, %v770_v38  }
 0xb10   :  { %806 = vset.pattern.permute.xlu1 %v881_v4 }
 0xb72   :  { %v469_v40 = vpop.permute.xlu1 %468 }
 0xb73   :  { %771 = vmatmul.msk.f32.vlgmr.msrb.gmra.mxu1 %vm56_vm0, %v469_v40 }
 0xb7a   :  { %v507_v46 = vpop.permute.xlu1 %506 }
 0xb7b   :  { %v509_v50 = vmul.f32 %v992_v18, %v507_v46 }
 0xbf0   :  { %v489_v45 = vpop.f32.mrf.mxu1 }
 0xbf1   :  { %v490_v47 = vadd.f32 %v982_v15, %v489_v45 }
 0xbf3   :  { %v498_v49 = vadd.f32 %v497_v44, %v490_v47 }
 0xbf5   :  { %v504_v51 = vadd.f32 %v503_v48, %v498_v49 }
 0xbf7   :  { %v510_v52 = vadd.f32 %v509_v50, %v504_v51 }
 0xbf9   :  { %v511_v53 = vmul.f32 %v510_v52, %v1000_v28 }
 0xbfb   :  { %839 = vtanh.f32 %v511_v53 }
 0xc01   :  { %v840_v54 = vpop.eup %839 }
 0xc02   :  { %v513_v55 = vmul.f32 %v840_v54, %v1000_v28 }
 0xc04   :  { %v514_v56 = vadd.f32 %v513_v55, %v1003_v32 }
 0xc06   :  { %517 = vrot.lane.b32.xlu2 %v514_v56, %s886_s3  ;;  %v515_v59 = vmul.f32 %v514_v56, %v445_v34 }
 0xc60   :  { %v518_v57 = vpop.permute.xlu2 %517 }
 0xc61   :  { %v520_v58 = vmul.f32 %v518_v57, %v514_v56 }
 0xc63   :  { %522 = vrot.lane.b32.xlu1 %v520_v58, %s883_s22 }
 0xc6b   :  { %574 = vperm.xlu1 %806, %v773_v63  }
 0xc73   :  { %810 = vset.pattern.permute.xlu1 %v884_v10  ;;  %v817_v10 = vld [vmem:[%s1213_s6] ss:$0 sm:$0xff] }
 0xcd5   :  { %v523_v60 = vpop.permute.xlu1 %522 }
 0xcd6   :  { %v525_v61 = vadd.f32 %v523_v60, %v515_v59 }
 0xcd8   :  { %841 = vtanh.f32 %v525_v61 }
 0xcdd   :  { %v575_v17 = vpop.permute.xlu1 %574 }
 0xcde   :  { %v842_v62 = vpop.eup %841  ;;  %v577_v20 = vmul.f32 %v977_v14, %v575_v17 }
 0xcdf   :  { %528 = vrot.lane.b32.xlu2 %v842_v62, %s886_s3 }
 0xce7   :  { %580 = vperm.xlu2 %807, %v773_v63  }
 0xcef   :  { %811 = vset.pattern.permute.xlu2 %v882_v6 }
 0xd39   :  { %v529_v0 = vpop.permute.xlu2 %528 }
 0xd3a   :  { %v1120_v2 = vmul.f32 %v529_v0, %v514_v56 }
 0xd3c   :  { %548 = vrot.lane.b32.xlu0 %v1120_v2, %s883_s22 }
 0xd41   :  { %v581_v19 = vpop.permute.xlu2 %580 }
 0xd42   :  { %v583_v23 = vmul.f32 %v987_v16, %v581_v19 }
 0xd44   :  { %586 = vperm.xlu0 %808, %v773_v63  }
 0xd4c   :  { %809 = vset.pattern.permute.xlu0 %v881_v4 }
 0xd4d   :  { %654 = vperm.xlu0 %809, %v776_v3  }
 0xd55   :  { %129 = vrot.lane.b32.xlu0 %v817_v10, %s887_s24 }
 0xdae   :  { %v549_v6 = vpop.permute.xlu0 %548 }
 0xdaf   :  { %774 = vmatmul.msk.f32.vlgmr.msrb.gmra.mxu2 %vm56_vm0, %v549_v6  ;;  %v888_v6 = vmov 0.0  }
 0xdb6   :  { %v587_v7 = vpop.permute.xlu0 %586 }
 0xdb7   :  { %v589_v24 = vmul.f32 %v992_v18, %v587_v7  ;;  %v760_v7 = vsel %vm220_vm4, 1.0, %v888_v6 }
 0xdbf   :  { %v655_v8 = vpop.permute.xlu0 %654 }
 0xdc0   :  { %v657_v45 = vmul.f32 %v977_v14, %v655_v8  ;;  %v757_v8 = vsel %vm140_vm5, 1.0, %v888_v6 }
 0xdc7   :  { %v1132_v9 = vpop.permute.xlu0 %129 }
 0xdc8   :  { %v212_v11 = vmul.f32 %v1031_v5, %v1132_v9  ;;  %v292_v12 = vmul.f32 %v1052_v39, %v1132_v9  ;;  %v132_v14 = vmul.f32 %v1132_v9, %v1010_v43  ;;  %v372_v43 = vmul.f32 %v1073_v1, %v1132_v9 }
 0xdc9   :  { %v532_v59 = vmul.f32 %v1120_v2, %v1132_v9 }
 0xdca   :  { %214 = vrot.lane.b32.xlu0 %v212_v11, %s883_s22 }
 0xdd2   :  { %294 = vrot.lane.b32.xlu0 %v292_v12, %s883_s22 }
 0xe32   :  { %v569_v21 = vpop.f32.mrf.mxu2 }
 0xe33   :  { %v570_v22 = vadd.f32 %v982_v15, %v569_v21 }
 0xe35   :  { %v578_v25 = vadd.f32 %v577_v20, %v570_v22 }
 0xe37   :  { %v584_v5 = vadd.f32 %v583_v23, %v578_v25 }
 0xe39   :  { %v590_v26 = vadd.f32 %v589_v24, %v584_v5 }
 0xe3b   :  { %v591_v27 = vmul.f32 %v590_v26, %v1000_v28 }
 0xe3d   :  { %843 = vtanh.f32 %v591_v27 }
 0xe43   :  { %v844_v39 = vpop.eup %843 }
 0xe44   :  { %v593_v29 = vmul.f32 %v844_v39, %v1000_v28  ;;  %v818_v39 = vld [vmem:[#allocation2] ss:$0 sm:$0xff] }
 0xe46   :  { %v594_v30 = vadd.f32 %v593_v29, %v1003_v32 }
 0xe48   :  { %597 = vrot.lane.b32.xlu1 %v594_v30, %s886_s3  ;;  %v595_v34 = vmul.f32 %v594_v30, %v525_v61 }
 0xeba   :  { %v598_v31 = vpop.permute.xlu1 %597 }
 0xebb   :  { %v600_v33 = vmul.f32 %v598_v31, %v594_v30 }
 0xebd   :  { %602 = vrot.lane.b32.xlu2 %v600_v33, %s883_s22  ;;  %v763_v33 = vsel %vm300_vm6, 1.0, %v888_v6 }
 0xf17   :  { %v603_v35 = vpop.permute.xlu2 %602 }
 0xf18   :  { %v605_v36 = vadd.f32 %v603_v35, %v595_v34 }
 0xf1a   :  { %845 = vtanh.f32 %v605_v36 }
 0xf20   :  { %v846_v38 = vpop.eup %845 }
 0xf21   :  { %608 = vrot.lane.b32.xlu1 %v846_v38, %s886_s3 }
 0xf29   :  { %660 = vperm.xlu1 %810, %v776_v3  }
 0xf31   :  { %812 = vset.pattern.permute.xlu1 %v881_v4 }
 0xf93   :  { %v609_v40 = vpop.permute.xlu1 %608 }
 0xf94   :  { %v611_v41 = vmul.f32 %v609_v40, %v594_v30  ;;  %v769_v40 = vsel %vm460_vm8, 1.0, %v888_v6 }
 0xf96   :  { %628 = vrot.lane.b32.xlu2 %v611_v41, %s883_s22 }
 0xf9b   :  { %v661_v44 = vpop.permute.xlu1 %660 }
 0xf9c   :  { %v663_v49 = vmul.f32 %v987_v16, %v661_v44 }
 0xf9e   :  { %666 = vperm.xlu2 %811, %v776_v3  }
 0xff0   :  { %v629_v42 = vpop.permute.xlu2 %628 }
 0xff1   :  { %777 = vmatmul.msk.f32.vlgmr.msrb.gmra.mxu3 %vm56_vm0, %v629_v42  ;;  %v772_v42 = vsel %vm540_vm9, 1.0, %v888_v6 }
 0xff8   :  { %v667_v47 = vpop.permute.xlu2 %666 }
 0xff9   :  { %v669_v4 = vmul.f32 %v992_v18, %v667_v47  ;;  %v452_v18 = vmul.f32 %v1094_v37, %v1132_v9  ;;  %v612_v37 = vmul.f32 %v611_v41, %v1132_v9 }
0x1074   :  { %v649_v46 = vpop.f32.mrf.mxu3 }
0x1075   :  { %v650_v48 = vadd.f32 %v982_v15, %v649_v46  ;;  %v215_v15 = vpop.permute.xlu0 %214 }
0x1076   :  { %v217_v16 = vsel %vm56_vm0, %v215_v15, 0.0 }
0x1077   :  { %v658_v50 = vadd.f32 %v657_v45, %v650_v48 }
0x1079   :  { %v664_v51 = vadd.f32 %v663_v49, %v658_v50  ;;  %v775_v50 = vsel %vm620_vm10, 1.0, %v888_v6 }
0x107b   :  { %v670_v52 = vadd.f32 %v669_v4, %v664_v51  ;;  %v778_v51 = vsel %vm700_vm11, 1.0, %v888_v6 }
0x107d   :  { %v671_v53 = vmul.f32 %v670_v52, %v1000_v28  ;;  %v295_v2 = vpop.permute.xlu0 %294 }
0x107e   :  { %v297_v10 = vsel %vm56_vm0, %v295_v2, 0.0 }
0x107f   :  { %847 = vtanh.f32 %v671_v53 }
0x1085   :  { %v848_v54 = vpop.eup %847 }
0x1086   :  { %v673_v55 = vmul.f32 %v848_v54, %v1000_v28 }
0x1088   :  { %v674_v56 = vadd.f32 %v673_v55, %v1003_v32 }
0x108a   :  { %677 = vrot.lane.b32.xlu1 %v674_v56, %s886_s3  ;;  %v675_v60 = vmul.f32 %v674_v56, %v605_v36 }
0x1092   :  { %134 = vrot.lane.b32.xlu1 %v132_v14, %s883_s22 }
0x10bc   :  { %218 = vadd.xlane.f32.xlu1 %v217_v16 }
0x10d5   :  { %454 = vrot.lane.b32.xlu1 %v452_v18, %s883_s22 }
0x10fc   :  { %v678_v57 = vpop.permute.xlu1 %677 }
0x10fd   :  { %v680_v28 = vmul.f32 %v678_v57, %v674_v56 }
0x10ff   :  { %682 = vrot.lane.b32.xlu2 %v680_v28, %s883_s22 }
0x1104   :  { %v135_v32 = vpop.permute.xlu1 %134 }
0x1105   :  { %v137_v58 = vsel %vm56_vm0, %v135_v32, 0.0 }
0x1128   :  { %138 = vadd.xlane.f32.xlu2 %v137_v58 }
0x112f   :  { %v219_v1 = vpop.xlane.xlu1 %218 }
0x1130   :  { %v223_v12 = vmul.f32 %v760_v7, %v219_v1 }
0x1140   :  { %374 = vrot.lane.b32.xlu2 %v372_v43, %s883_s22 }
0x1147   :  { %v455_v0 = vpop.permute.xlu1 %454 }
0x1148   :  { %534 = vrot.lane.b32.xlu2 %v532_v59, %s883_s22  ;;  %v457_v3 = vsel %vm56_vm0, %v455_v0, 0.0 }
0x1150   :  { %614 = vrot.lane.b32.xlu2 %v612_v37, %s883_s22 }
0x1159   :  { %v683_v61 = vpop.permute.xlu2 %682 }
0x115a   :  { %v1178_v62 = vadd.f32 %v683_v61, %v675_v60 }
0x115c   :  { %849 = vtanh.f32 %v1178_v62 }
0x1162   :  { %v850_v63 = vpop.eup %849 }
0x1163   :  { %688 = vrot.lane.b32.xlu0 %v850_v63, %s886_s3 }
0x1179   :  { %458 = vadd.xlane.f32.xlu2 %v457_v3 }
0x118d   :  { %298 = vadd.xlane.f32.xlu0 %v297_v10 }
0x119b   :  { %v139_v11 = vpop.xlane.xlu2 %138 }
0x119c   :  { %v143_v17 = vmul.f32 %v757_v8, %v139_v11 }
0x119e   :  { %v224_v19 = vadd.f32 %v223_v12, %v143_v17 }
0x11a3   :  { %v375_v20 = vpop.permute.xlu2 %374 }
0x11a4   :  { %v377_v21 = vsel %vm56_vm0, %v375_v20, 0.0 }
0x11a5   :  { %378 = vadd.xlane.f32.xlu1 %v377_v21 }
0x11ab   :  { %v535_v22 = vpop.permute.xlu2 %534 }
0x11ac   :  { %v537_v27 = vsel %vm56_vm0, %v535_v22, 0.0 }
0x11b3   :  { %v615_v23 = vpop.permute.xlu2 %614 }
0x11b4   :  { %v617_v24 = vsel %vm56_vm0, %v615_v23, 0.0 }
0x11b5   :  { %618 = vadd.xlane.f32.xlu1 %v617_v24 }
0x11ce   :  { %709 = vperm.xlu1 %812, %v818_v39  }
0x11d5   :  { %v689_v25 = vpop.permute.xlu0 %688 }
0x11d6   :  { %v691_v5 = vmul.f32 %v689_v25, %v674_v56 }
0x11d8   :  { %v692_v26 = vmul.f32 %v691_v5, %v1132_v9  ;;  %v766_v9 = vsel %vm380_vm7, 1.0, %v888_v6 }
0x11da   :  { %694 = vrot.lane.b32.xlu0 %v692_v26, %s883_s22 }
0x11ec   :  { %v459_v41 = vpop.xlane.xlu2 %458 }
0x11ed   :  { %v463_v46 = vmul.f32 %v769_v40, %v459_v41 }
0x1200   :  { %v299_v29 = vpop.xlane.xlu0 %298 }
0x1201   :  { %v303_v35 = vmul.f32 %v763_v33, %v299_v29 }
0x1203   :  { %v304_v38 = vadd.f32 %v303_v35, %v224_v19 }
0x1204   :  { %538 = vadd.xlane.f32.xlu0 %v537_v27 }
0x1218   :  { %v379_v34 = vpop.xlane.xlu1 %378 }
0x1219   :  { %v383_v36 = vmul.f32 %v766_v9, %v379_v34 }
0x121b   :  { %v384_v45 = vadd.f32 %v383_v36, %v304_v38 }
0x121d   :  { %v464_v49 = vadd.f32 %v463_v46, %v384_v45 }
0x1228   :  { %v619_v48 = vpop.xlane.xlu1 %618 }
0x1229   :  { %v623_v52 = vmul.f32 %v775_v50, %v619_v48 }
0x1240   :  { %v710_v56 = vpop.permute.xlu1 %709 }
0x124c   :  { %v695_v30 = vpop.permute.xlu0 %694 }
0x124d   :  { %v697_v31 = vsel %vm56_vm0, %v695_v30, 0.0 }
0x124e   :  { %698 = vadd.xlane.f32.xlu2 %v697_v31 }
0x1266   :  { %729 = vrot.lane.b32.xlu2 %v691_v5, %s883_s22  ;;  %s889_s22 = smov [#allocation3]  }
0x1267   :  { %s741_s1 = sshll.u32 %s889_s22, 4  ;;  %s742_s1 = int_to_ptr.vmem [resolvable:$true] %s741_s1 }
0x1277   :  { %v539_v44 = vpop.xlane.xlu0 %538 }
0x1278   :  { %v543_v47 = vmul.f32 %v772_v42, %v539_v44 }
0x127a   :  { %v544_v4 = vadd.f32 %v543_v47, %v464_v49 }
0x127c   :  { %v624_v55 = vadd.f32 %v623_v52, %v544_v4 }
0x12c1   :  { %v699_v53 = vpop.xlane.xlu2 %698 }
0x12c2   :  { %v703_v54 = vmul.f32 %v778_v51, %v699_v53 }
0x12c4   :  { %v704_v14 = vadd.f32 %v703_v54, %v624_v55 }
0x12c6   :  { %v712_v15 = vadd.f32 %v710_v56, %v704_v14 }
0x12c8   :  { %v714_v16 = vmin.f32 %v712_v15, 20.0  ;;  %vm713_vm14 = vcmp.gt.f32.partialorder %v712_v15, 20.0 }
0x12c9   :  { %v730_v18 = vpop.permute.xlu2 %729 }
0x12ca   :  { %v715_v57 = vmul.f32 1.442695, %v714_v16  ;;  %v732_v28 = vsel %vm56_vm0, %v730_v18, %v1178_v62 }
0x12cb   :  { %v734_v32 = vsel %vm733_vm12, %v732_v28, 0.0 }
0x12cc   :  { %851 = vpow2.f32 %v715_v57  ;;  %735 = vst [vmem:[%s1216_s9] sm:$0xff] %v734_v32 }
0x12d2   :  { %v852_v13 = vpop.eup %851 }
0x12d3   :  { %v717_v58 = vadd.f32 1.0, %v852_v13  ;;  %v720_v43 = vmul.f32 -0.5, %v852_v13  ;;  %v723_v37 = vand.u32 2147483647, %v852_v13 }
0x12d5   :  { %853 = vlog2.f32 %v717_v58  ;;  %v721_v59 = vadd.f32 1.0, %v720_v43  ;;  %vm724_vm13 = vcmp.lt.f32.partialorder %v723_v37, 0.0004427343 }
0x12d7   :  { %v722_v62 = vmul.f32 %v852_v13, %v721_v59 }
0x12db   :  { %v854_v60 = vpop.eup %853 }
0x12dc   :  { %v719_v61 = vmul.f32 0.6931472, %v854_v60 }
0x12de   :  { %v725_v63 = vsel %vm724_vm13, %v722_v62, %v719_v61 }
0x12df   :  { %v726_v1 = vsel %vm713_vm14, %v712_v15, %v725_v63 }
0x12e0   :  { %727 = vst [vmem:[#allocation3] sm:$0xff] %v726_v1 }
0x12e1   :  { %746 = dma.vmem_to_hbm [thread:$0]  %s742_s1, 128, %s744_s25, [#allocation4]  }
0x12e2   :  { %879 = dma.done.wait [#allocation4], 128  }
0x12e3   :  { %880 = vsyncadd [#allocation4], 4294967168 }
0x12e4   :  { %755 = vsyncpa [#allocation4], 1 }

</bundles_post_ra>
